<compile_context>
chip_gen: v5e
topology: v5e:2x2
jax: 0.10.0
libtpu: 0.0.40
codegen_flags: <defaults>
</compile_context>

<pallas_src>
import functools

import jax
import jax.numpy as jnp
from jax import lax
from jax.experimental import pallas as pl
from jax.experimental.pallas import tpu as pltpu


def _round_up(x, m):
    return (x + m - 1) // m * m


# ----------------------------- Pallas kernel ------------------------------- #

def _shift_rows(v, s):
    """u[r] = v[r + s] with zero fill; s is a static multiple of the pixel tile."""
    if s == 0:
        return v
    z = jnp.zeros((abs(s), v.shape[1]), v.dtype)
    if s > 0:
        return jnp.concatenate([v[s:, :], z], axis=0)
    return jnp.concatenate([z, v[:s, :]], axis=0)


def _tempcnn_kernel(x_ref, w1_ref, s1_ref, w2_ref, s2_ref, w3_ref, s3_ref,
                    wd_ref, sd_ref, wc_ref, bc_ref, o_ref, *,
                    seqlen, ksize, tile_b):
    T, TB, K = seqlen, tile_b, ksize
    pad = K // 2
    R = T * TB

    # (T, TB, Cin) -> (T*TB, Cin); TB is a multiple of 8, so the sublane-axis
    # concatenation is tile-aligned (cheap).
    x = jnp.concatenate([x_ref[t] for t in range(T)], axis=0)

    def conv_block(v, w_ref, s_ref):
        # v: (R, Cin) bf16, rows ordered (t, pixel).  Conv1d(K, padding=K//2) with
        # folded BN:  y = relu(sum_k shift(v, (k-pad)*TB) @ W[k] + shift)
        h_dim = w_ref.shape[2]
        acc = jnp.zeros((R, h_dim), jnp.float32)
        for k in range(K):
            acc = acc + jnp.dot(_shift_rows(v, (k - pad) * TB), w_ref[k],
                                preferred_element_type=jnp.float32)
        return jnp.maximum(acc + s_ref[...], 0.0).astype(v.dtype)

    h = conv_block(x, w1_ref, s1_ref)
    h = conv_block(h, w2_ref, s2_ref)
    h = conv_block(h, w3_ref, s3_ref)                       # (R, H) bf16

    # Dense layer: torch's channel-major flatten is pre-folded into the weight row
    # order, so it reduces to T aligned (TB, H) @ (H, 4H) matmuls.
    H = w3_ref.shape[2]
    ND = wd_ref.shape[1]
    acc = jnp.zeros((TB, ND), jnp.float32)
    for t in range(T):
        acc = acc + jnp.dot(h[t * TB:(t + 1) * TB, :],
                            wd_ref[pl.ds(t * H, H), :],
                            preferred_element_type=jnp.float32)
    xd = jnp.maximum(acc + sd_ref[...], 0.0).astype(x.dtype)  # (TB, 4H) bf16

    # Classifier + LogSoftmax over the lane-padded class axis.  Padded bias columns
    # are -1e30 so they contribute exp(...)=0 to the log-sum-exp (exact).
    z = jnp.dot(xd, wc_ref[...], preferred_element_type=jnp.float32) + bc_ref[...]
    m = jnp.max(z, axis=-1, keepdims=True)
    lse = m + jnp.log(jnp.sum(jnp.exp(z - m), axis=-1, keepdims=True))
    o_ref[...] = z - lse                                     # lane-dense (TB, 128) store


# ------------------------------ JAX wrapper --------------------------------- #

def tempcnn_forward(x5, params, *, row_tile=64):
    """x5: (b, t, c, h, w) -- same axis convention as the PyTorch forward."""
    x5 = x5[:, :, :-1, :, :]                                 # drop last channel
    b, t, c, h, w = x5.shape
    bp = b * h * w
    T = t
    K = params["convs"][0][0].shape[0]

    # 'b t c h w -> t (b h w) c'  (time-major so conv shifts are aligned row blocks)
    x = jnp.transpose(x5, (1, 0, 3, 4, 2)).reshape(T, bp, c)

    tile_b = min(row_tile, _round_up(bp, 8))
    bp_pad = _round_up(bp, tile_b)
    if bp_pad != bp:
        x = jnp.pad(x, ((0, 0), (0, bp_pad - bp), (0, 0)))
    x = x.astype(jnp.bfloat16)

    # ---- fold BatchNorm(eval) + bias into the weights (host side, exact) ----
    conv_w, conv_s = [], []
    for lw, lb, lscale, lshift in params["convs"]:
        conv_w.append((lw * lscale).astype(jnp.bfloat16))          # (K, Cin, H)
        conv_s.append((lb * lscale + lshift).reshape(1, -1))       # (1, H) f32

    dw, db, dscale, dshift = params["dense"]
    H = conv_w[-1].shape[2]
    ND = dw.shape[1]
    # torch flatten index is c*T + t; reorder rows to t*H + c for aligned slicing.
    dw_perm = dw.reshape(H, T, ND).transpose(1, 0, 2).reshape(T * H, ND)
    wd = (dw_perm * dscale).astype(jnp.bfloat16)                   # (T*H, 4H)
    sd = (db * dscale + dshift).reshape(1, -1)                     # (1, 4H) f32

    cw, cb = params["cls"]
    ncls = cw.shape[1]
    npad = _round_up(max(ncls, 128), 128)                          # lane-dense output
    wc = jnp.zeros((cw.shape[0], npad), jnp.float32).at[:, :ncls].set(cw)
    wc = wc.astype(jnp.bfloat16)
    bc = jnp.full((1, npad), -1e30, jnp.float32).at[0, :ncls].set(cb)

    kernel = functools.partial(_tempcnn_kernel, seqlen=T, ksize=K, tile_b=tile_b)

    def full(shape):
        return pl.BlockSpec(shape, lambda i, _s=shape: tuple(0 for _ in _s))

    in_specs = [
        pl.BlockSpec((T, tile_b, c), lambda i: (0, i, 0)),
        full(conv_w[0].shape), full(conv_s[0].shape),
        full(conv_w[1].shape), full(conv_s[1].shape),
        full(conv_w[2].shape), full(conv_s[2].shape),
        full(wd.shape), full(sd.shape),
        full(wc.shape), full(bc.shape),
    ]
    out_spec = pl.BlockSpec((tile_b, npad), lambda i: (i, 0))

    args = (x, conv_w[0], conv_s[0], conv_w[1], conv_s[1], conv_w[2], conv_s[2],
            wd, sd, wc, bc)

    flops = (2 * bp * T * K * (c * H + 2 * H * H)    # 3 conv layers
             + 2 * bp * (H * T) * ND                 # dense
             + 2 * bp * ND * npad)                   # classifier
    bytes_accessed = sum(int(a.size) * a.dtype.itemsize for a in args) \
        + bp_pad * npad * 4
    cost = pl.CostEstimate(flops=int(flops),
                           transcendentals=int(bp_pad * (npad + 1)),
                           bytes_accessed=int(bytes_accessed))

    out = pl.pallas_call(
        kernel,
        out_shape=jax.ShapeDtypeStruct((bp_pad, npad), jnp.float32),
        grid=(bp_pad // tile_b,),
        in_specs=in_specs,
        out_specs=out_spec,
        compiler_params=pltpu.CompilerParams(dimension_semantics=("parallel",)),
        cost_estimate=cost,
    )(*args)

    logp = out[:bp, :ncls]
    # '(b h w) c -> b c h w'
    return logp.reshape(b, h, w, ncls).transpose(0, 3, 1, 2)


# ------------------------------ parameters ---------------------------------- #

def init_params(key, input_dim, hidden_dims, sequencelength, kernel_size, num_classes):
    eps = 1e-5
    keys = jax.random.split(key, 16)
    ki = iter(keys)

    def bn(k, n):
        k1, k2, k3, k4 = jax.random.split(k, 4)
        gamma = 1.0 + 0.1 * jax.random.normal(k1, (n,), jnp.float32)
        beta = 0.1 * jax.random.normal(k2, (n,), jnp.float32)
        mean = 0.1 * jax.random.normal(k3, (n,), jnp.float32)
        var = 1.0 + 0.1 * jnp.abs(jax.random.normal(k4, (n,), jnp.float32))
        scale = gamma / jnp.sqrt(var + eps)
        shift = beta - mean * scale
        return scale, shift

    convs = []
    cin = input_dim
    for _ in range(3):
        wconv = 0.1 * jax.random.normal(next(ki), (kernel_size, cin, hidden_dims), jnp.float32)
        bconv = 0.1 * jax.random.normal(next(ki), (hidden_dims,), jnp.float32)
        scale, shift = bn(next(ki), hidden_dims)
        convs.append((wconv, bconv, scale, shift))
        cin = hidden_dims

    dw = 0.05 * jax.random.normal(next(ki), (hidden_dims * sequencelength, 4 * hidden_dims), jnp.float32)
    db = 0.1 * jax.random.normal(next(ki), (4 * hidden_dims,), jnp.float32)
    dscale, dshift = bn(next(ki), 4 * hidden_dims)

    cw = 0.1 * jax.random.normal(next(ki), (4 * hidden_dims, num_classes), jnp.float32)
    cb = 0.1 * jax.random.normal(next(ki), (num_classes,), jnp.float32)

    return {"convs": convs, "dense": (dw, db, dscale, dshift), "cls": (cw, cb)}


# --------------------------- pure-JAX reference ----------------------------- #

def reference_forward(x5, params):
    x5 = x5[:, :, :-1, :, :]
    b, t, c, h, w = x5.shape
    x = jnp.transpose(x5, (0, 3, 4, 1, 2)).reshape(b * h * w, t, c)  # (B, T, C)
    x = jnp.transpose(x, (0, 2, 1))                                  # (B, C, T) NCW
    for lw, lb, lscale, lshift in params["convs"]:
        K = lw.shape[0]
        w_oiw = jnp.transpose(lw, (2, 1, 0))                         # (O, I, K)
        y = lax.conv_general_dilated(x, w_oiw, window_strides=(1,),
                                     padding=[(K // 2, K // 2)],
                                     dimension_numbers=("NCH", "OIH", "NCH"))
        y = y + lb[None, :, None]
        y = y * lscale[None, :, None] + lshift[None, :, None]
        x = jnp.maximum(y, 0.0)                                      # (B, Cout, T)
    B = x.shape[0]
    xflat = x.reshape(B, -1)
    dw, db, dscale, dshift = params["dense"]
    xd = jnp.maximum((xflat @ dw + db) * dscale + dshift, 0.0)
    cw, cb = params["cls"]
    logp = jax.nn.log_softmax(xd @ cw + cb, axis=-1)
    ncls = logp.shape[-1]
    return logp.reshape(b, h, w, ncls).transpose(0, 3, 1, 2)


# --------------------------------- main ------------------------------------ #

if __name__ == "__main__":
    # Small TempCNN configuration (analogue of the defaults, scaled down).
    input_dim = 4
    num_classes = 9
    sequencelength = 8
    kernel_size = 5
    hidden_dims = 32

    b, h, w = 2, 2, 2
    key = jax.random.PRNGKey(0)
    kx, kp = jax.random.split(key)

    # raw input has input_dim + 1 channels; the forward drops the last one
    x = jax.random.normal(kx, (b, sequencelength, input_dim + 1, h, w), jnp.float32)

    params = init_params(kp, input_dim, hidden_dims, sequencelength,
                         kernel_size, num_classes)

    out = jax.block_until_ready(tempcnn_forward(x, params))
    ref = jax.block_until_ready(reference_forward(x, params))

    assert out.shape == (b, num_classes, h, w), out.shape
    max_err = float(jnp.max(jnp.abs(out - ref)))
    # bf16 matmul operands (f32 accumulation/epilogues) -> slightly relaxed tolerance
    if not bool(jnp.allclose(out, ref, atol=2e-2, rtol=2e-2)):
        raise AssertionError(f"mismatch vs reference, max abs err = {max_err}")

    print("KERNEL_OK")
</pallas_src>

<mosaic_0001>
module attributes {stable_mosaic.version = 11 : i64} {
  func.func @_tempcnn_kernel(%arg0: i32, %arg1: memref<8x8x4xbf16, #tpu.memory_space<vmem>>, %arg2: memref<5x4x32xbf16, #tpu.memory_space<vmem>>, %arg3: memref<1x32xf32, #tpu.memory_space<vmem>>, %arg4: memref<5x32x32xbf16, #tpu.memory_space<vmem>>, %arg5: memref<1x32xf32, #tpu.memory_space<vmem>>, %arg6: memref<5x32x32xbf16, #tpu.memory_space<vmem>>, %arg7: memref<1x32xf32, #tpu.memory_space<vmem>>, %arg8: memref<256x128xbf16, #tpu.memory_space<vmem>>, %arg9: memref<1x128xf32, #tpu.memory_space<vmem>>, %arg10: memref<128x128xbf16, #tpu.memory_space<vmem>>, %arg11: memref<1x128xf32, #tpu.memory_space<vmem>>, %arg12: memref<8x128xf32, #tpu.memory_space<vmem>>) attributes {dimension_semantics = [#tpu.dimension_semantics<parallel>], iteration_bounds = array<i64: 1>, scalar_prefetch = 0 : i64, scratch_operands = 0 : i64, tpu.core_type = #tpu.core_type<tc>, window_params = [{transform_indices = @transform_0, window_bounds = array<i64: 8, 8, 4>}, {pipeline_mode = #tpu.pipeline_mode<synchronous>, transform_indices = @transform_1, window_bounds = array<i64: 5, 4, 32>}, {pipeline_mode = #tpu.pipeline_mode<synchronous>, transform_indices = @transform_2, window_bounds = array<i64: 1, 32>}, {pipeline_mode = #tpu.pipeline_mode<synchronous>, transform_indices = @transform_3, window_bounds = array<i64: 5, 32, 32>}, {pipeline_mode = #tpu.pipeline_mode<synchronous>, transform_indices = @transform_4, window_bounds = array<i64: 1, 32>}, {pipeline_mode = #tpu.pipeline_mode<synchronous>, transform_indices = @transform_5, window_bounds = array<i64: 5, 32, 32>}, {pipeline_mode = #tpu.pipeline_mode<synchronous>, transform_indices = @transform_6, window_bounds = array<i64: 1, 32>}, {pipeline_mode = #tpu.pipeline_mode<synchronous>, transform_indices = @transform_7, window_bounds = array<i64: 256, 128>}, {pipeline_mode = #tpu.pipeline_mode<synchronous>, transform_indices = @transform_8, window_bounds = array<i64: 1, 128>}, {pipeline_mode = #tpu.pipeline_mode<synchronous>, transform_indices = @transform_9, window_bounds = array<i64: 128, 128>}, {pipeline_mode = #tpu.pipeline_mode<synchronous>, transform_indices = @transform_10, window_bounds = array<i64: 1, 128>}, {transform_indices = @transform_11, window_bounds = array<i64: 8, 128>}]} {
    %c0 = arith.constant 0 : index
    %c0_0 = arith.constant 0 : index
    %c0_1 = arith.constant 0 : index
    %0 = vector.load %arg1[%c0, %c0_0, %c0_1] : memref<8x8x4xbf16, #tpu.memory_space<vmem>>, vector<1x8x4xbf16>
    %1 = vector.shape_cast %0 : vector<1x8x4xbf16> to vector<8x4xbf16>
    %c1 = arith.constant 1 : index
    %c0_2 = arith.constant 0 : index
    %c0_3 = arith.constant 0 : index
    %2 = vector.load %arg1[%c1, %c0_2, %c0_3] : memref<8x8x4xbf16, #tpu.memory_space<vmem>>, vector<1x8x4xbf16>
    %3 = vector.shape_cast %2 : vector<1x8x4xbf16> to vector<8x4xbf16>
    %c2 = arith.constant 2 : index
    %c0_4 = arith.constant 0 : index
    %c0_5 = arith.constant 0 : index
    %4 = vector.load %arg1[%c2, %c0_4, %c0_5] : memref<8x8x4xbf16, #tpu.memory_space<vmem>>, vector<1x8x4xbf16>
    %5 = vector.shape_cast %4 : vector<1x8x4xbf16> to vector<8x4xbf16>
    %c3 = arith.constant 3 : index
    %c0_6 = arith.constant 0 : index
    %c0_7 = arith.constant 0 : index
    %6 = vector.load %arg1[%c3, %c0_6, %c0_7] : memref<8x8x4xbf16, #tpu.memory_space<vmem>>, vector<1x8x4xbf16>
    %7 = vector.shape_cast %6 : vector<1x8x4xbf16> to vector<8x4xbf16>
    %c4 = arith.constant 4 : index
    %c0_8 = arith.constant 0 : index
    %c0_9 = arith.constant 0 : index
    %8 = vector.load %arg1[%c4, %c0_8, %c0_9] : memref<8x8x4xbf16, #tpu.memory_space<vmem>>, vector<1x8x4xbf16>
    %9 = vector.shape_cast %8 : vector<1x8x4xbf16> to vector<8x4xbf16>
    %c5 = arith.constant 5 : index
    %c0_10 = arith.constant 0 : index
    %c0_11 = arith.constant 0 : index
    %10 = vector.load %arg1[%c5, %c0_10, %c0_11] : memref<8x8x4xbf16, #tpu.memory_space<vmem>>, vector<1x8x4xbf16>
    %11 = vector.shape_cast %10 : vector<1x8x4xbf16> to vector<8x4xbf16>
    %c6 = arith.constant 6 : index
    %c0_12 = arith.constant 0 : index
    %c0_13 = arith.constant 0 : index
    %12 = vector.load %arg1[%c6, %c0_12, %c0_13] : memref<8x8x4xbf16, #tpu.memory_space<vmem>>, vector<1x8x4xbf16>
    %13 = vector.shape_cast %12 : vector<1x8x4xbf16> to vector<8x4xbf16>
    %c7 = arith.constant 7 : index
    %c0_14 = arith.constant 0 : index
    %c0_15 = arith.constant 0 : index
    %14 = vector.load %arg1[%c7, %c0_14, %c0_15] : memref<8x8x4xbf16, #tpu.memory_space<vmem>>, vector<1x8x4xbf16>
    %15 = vector.shape_cast %14 : vector<1x8x4xbf16> to vector<8x4xbf16>
    %16 = tpu.concatenate %1, %3, %5, %7, %9, %11, %13, %15 in 0 : vector<8x4xbf16>, vector<8x4xbf16>, vector<8x4xbf16>, vector<8x4xbf16>, vector<8x4xbf16>, vector<8x4xbf16>, vector<8x4xbf16>, vector<8x4xbf16> -> vector<64x4xbf16>
    %cst = arith.constant 0.000000e+00 : f32
    %17 = vector.broadcast %cst : f32 to vector<64x32xf32>
    %cst_16 = arith.constant 0.000000e+00 : bf16
    %18 = vector.broadcast %cst_16 : bf16 to vector<16x4xbf16>
    %19 = vector.extract_strided_slice %16 {offsets = [0, 0], sizes = [48, 4], strides = [1, 1]} : vector<64x4xbf16> to vector<48x4xbf16>
    %20 = tpu.concatenate %18, %19 in 0 : vector<16x4xbf16>, vector<48x4xbf16> -> vector<64x4xbf16>
    %c0_17 = arith.constant 0 : index
    %c0_18 = arith.constant 0 : index
    %c0_19 = arith.constant 0 : index
    %21 = vector.load %arg2[%c0_17, %c0_18, %c0_19] : memref<5x4x32xbf16, #tpu.memory_space<vmem>>, vector<1x4x32xbf16>
    %22 = vector.shape_cast %21 : vector<1x4x32xbf16> to vector<4x32xbf16>
    %cst_20 = arith.constant dense<0.000000e+00> : vector<64x32xf32>
    %23 = tpu.matmul %20, %22, %cst_20 {dimension_numbers = #tpu.dot_dimension_numbers<[1], [0], [0], [1], [0, 0, 1, 1], [], []>} : vector<64x4xbf16>, vector<4x32xbf16>, vector<64x32xf32> -> vector<64x32xf32>
    %24 = arith.addf %17, %23 : vector<64x32xf32>
    %cst_21 = arith.constant 0.000000e+00 : bf16
    %25 = vector.broadcast %cst_21 : bf16 to vector<8x4xbf16>
    %26 = vector.extract_strided_slice %16 {offsets = [0, 0], sizes = [56, 4], strides = [1, 1]} : vector<64x4xbf16> to vector<56x4xbf16>
    %27 = tpu.concatenate %25, %26 in 0 : vector<8x4xbf16>, vector<56x4xbf16> -> vector<64x4xbf16>
    %c1_22 = arith.constant 1 : index
    %c0_23 = arith.constant 0 : index
    %c0_24 = arith.constant 0 : index
    %28 = vector.load %arg2[%c1_22, %c0_23, %c0_24] : memref<5x4x32xbf16, #tpu.memory_space<vmem>>, vector<1x4x32xbf16>
    %29 = vector.shape_cast %28 : vector<1x4x32xbf16> to vector<4x32xbf16>
    %cst_25 = arith.constant dense<0.000000e+00> : vector<64x32xf32>
    %30 = tpu.matmul %27, %29, %cst_25 {dimension_numbers = #tpu.dot_dimension_numbers<[1], [0], [0], [1], [0, 0, 1, 1], [], []>} : vector<64x4xbf16>, vector<4x32xbf16>, vector<64x32xf32> -> vector<64x32xf32>
    %31 = arith.addf %24, %30 : vector<64x32xf32>
    %c2_26 = arith.constant 2 : index
    %c0_27 = arith.constant 0 : index
    %c0_28 = arith.constant 0 : index
    %32 = vector.load %arg2[%c2_26, %c0_27, %c0_28] : memref<5x4x32xbf16, #tpu.memory_space<vmem>>, vector<1x4x32xbf16>
    %33 = vector.shape_cast %32 : vector<1x4x32xbf16> to vector<4x32xbf16>
    %cst_29 = arith.constant dense<0.000000e+00> : vector<64x32xf32>
    %34 = tpu.matmul %16, %33, %cst_29 {dimension_numbers = #tpu.dot_dimension_numbers<[1], [0], [0], [1], [0, 0, 1, 1], [], []>} : vector<64x4xbf16>, vector<4x32xbf16>, vector<64x32xf32> -> vector<64x32xf32>
    %35 = arith.addf %31, %34 : vector<64x32xf32>
    %cst_30 = arith.constant 0.000000e+00 : bf16
    %36 = vector.broadcast %cst_30 : bf16 to vector<8x4xbf16>
    %37 = vector.extract_strided_slice %16 {offsets = [8, 0], sizes = [56, 4], strides = [1, 1]} : vector<64x4xbf16> to vector<56x4xbf16>
    %38 = tpu.concatenate %37, %36 in 0 : vector<56x4xbf16>, vector<8x4xbf16> -> vector<64x4xbf16>
    %c3_31 = arith.constant 3 : index
    %c0_32 = arith.constant 0 : index
    %c0_33 = arith.constant 0 : index
    %39 = vector.load %arg2[%c3_31, %c0_32, %c0_33] : memref<5x4x32xbf16, #tpu.memory_space<vmem>>, vector<1x4x32xbf16>
    %40 = vector.shape_cast %39 : vector<1x4x32xbf16> to vector<4x32xbf16>
    %cst_34 = arith.constant dense<0.000000e+00> : vector<64x32xf32>
    %41 = tpu.matmul %38, %40, %cst_34 {dimension_numbers = #tpu.dot_dimension_numbers<[1], [0], [0], [1], [0, 0, 1, 1], [], []>} : vector<64x4xbf16>, vector<4x32xbf16>, vector<64x32xf32> -> vector<64x32xf32>
    %42 = arith.addf %35, %41 : vector<64x32xf32>
    %cst_35 = arith.constant 0.000000e+00 : bf16
    %43 = vector.broadcast %cst_35 : bf16 to vector<16x4xbf16>
    %44 = vector.extract_strided_slice %16 {offsets = [16, 0], sizes = [48, 4], strides = [1, 1]} : vector<64x4xbf16> to vector<48x4xbf16>
    %45 = tpu.concatenate %44, %43 in 0 : vector<48x4xbf16>, vector<16x4xbf16> -> vector<64x4xbf16>
    %c4_36 = arith.constant 4 : index
    %c0_37 = arith.constant 0 : index
    %c0_38 = arith.constant 0 : index
    %46 = vector.load %arg2[%c4_36, %c0_37, %c0_38] : memref<5x4x32xbf16, #tpu.memory_space<vmem>>, vector<1x4x32xbf16>
    %47 = vector.shape_cast %46 : vector<1x4x32xbf16> to vector<4x32xbf16>
    %cst_39 = arith.constant dense<0.000000e+00> : vector<64x32xf32>
    %48 = tpu.matmul %45, %47, %cst_39 {dimension_numbers = #tpu.dot_dimension_numbers<[1], [0], [0], [1], [0, 0, 1, 1], [], []>} : vector<64x4xbf16>, vector<4x32xbf16>, vector<64x32xf32> -> vector<64x32xf32>
    %49 = arith.addf %42, %48 : vector<64x32xf32>
    %c0_40 = arith.constant 0 : index
    %c0_41 = arith.constant 0 : index
    %50 = vector.load %arg3[%c0_40, %c0_41] : memref<1x32xf32, #tpu.memory_space<vmem>>, vector<1x32xf32>
    %51 = vector.broadcast %50 : vector<1x32xf32> to vector<64x32xf32>
    %52 = arith.addf %49, %51 : vector<64x32xf32>
    %cst_42 = arith.constant 0.000000e+00 : f32
    %53 = vector.broadcast %cst_42 : f32 to vector<64x32xf32>
    %54 = arith.maximumf %52, %53 : vector<64x32xf32>
    %55 = arith.truncf %54 : vector<64x32xf32> to vector<64x32xbf16>
    %cst_43 = arith.constant 0.000000e+00 : f32
    %56 = vector.broadcast %cst_43 : f32 to vector<64x32xf32>
    %cst_44 = arith.constant 0.000000e+00 : bf16
    %57 = vector.broadcast %cst_44 : bf16 to vector<16x32xbf16>
    %58 = vector.extract_strided_slice %55 {offsets = [0, 0], sizes = [48, 32], strides = [1, 1]} : vector<64x32xbf16> to vector<48x32xbf16>
    %59 = tpu.concatenate %57, %58 in 0 : vector<16x32xbf16>, vector<48x32xbf16> -> vector<64x32xbf16>
    %c0_45 = arith.constant 0 : index
    %c0_46 = arith.constant 0 : index
    %c0_47 = arith.constant 0 : index
    %60 = vector.load %arg4[%c0_45, %c0_46, %c0_47] : memref<5x32x32xbf16, #tpu.memory_space<vmem>>, vector<1x32x32xbf16>
    %61 = vector.shape_cast %60 : vector<1x32x32xbf16> to vector<32x32xbf16>
    %cst_48 = arith.constant dense<0.000000e+00> : vector<64x32xf32>
    %62 = tpu.matmul %59, %61, %cst_48 {dimension_numbers = #tpu.dot_dimension_numbers<[1], [0], [0], [1], [0, 0, 1, 1], [], []>} : vector<64x32xbf16>, vector<32x32xbf16>, vector<64x32xf32> -> vector<64x32xf32>
    %63 = arith.addf %56, %62 : vector<64x32xf32>
    %cst_49 = arith.constant 0.000000e+00 : bf16
    %64 = vector.broadcast %cst_49 : bf16 to vector<8x32xbf16>
    %65 = vector.extract_strided_slice %55 {offsets = [0, 0], sizes = [56, 32], strides = [1, 1]} : vector<64x32xbf16> to vector<56x32xbf16>
    %66 = tpu.concatenate %64, %65 in 0 : vector<8x32xbf16>, vector<56x32xbf16> -> vector<64x32xbf16>
    %c1_50 = arith.constant 1 : index
    %c0_51 = arith.constant 0 : index
    %c0_52 = arith.constant 0 : index
    %67 = vector.load %arg4[%c1_50, %c0_51, %c0_52] : memref<5x32x32xbf16, #tpu.memory_space<vmem>>, vector<1x32x32xbf16>
    %68 = vector.shape_cast %67 : vector<1x32x32xbf16> to vector<32x32xbf16>
    %cst_53 = arith.constant dense<0.000000e+00> : vector<64x32xf32>
    %69 = tpu.matmul %66, %68, %cst_53 {dimension_numbers = #tpu.dot_dimension_numbers<[1], [0], [0], [1], [0, 0, 1, 1], [], []>} : vector<64x32xbf16>, vector<32x32xbf16>, vector<64x32xf32> -> vector<64x32xf32>
    %70 = arith.addf %63, %69 : vector<64x32xf32>
    %c2_54 = arith.constant 2 : index
    %c0_55 = arith.constant 0 : index
    %c0_56 = arith.constant 0 : index
    %71 = vector.load %arg4[%c2_54, %c0_55, %c0_56] : memref<5x32x32xbf16, #tpu.memory_space<vmem>>, vector<1x32x32xbf16>
    %72 = vector.shape_cast %71 : vector<1x32x32xbf16> to vector<32x32xbf16>
    %cst_57 = arith.constant dense<0.000000e+00> : vector<64x32xf32>
    %73 = tpu.matmul %55, %72, %cst_57 {dimension_numbers = #tpu.dot_dimension_numbers<[1], [0], [0], [1], [0, 0, 1, 1], [], []>} : vector<64x32xbf16>, vector<32x32xbf16>, vector<64x32xf32> -> vector<64x32xf32>
    %74 = arith.addf %70, %73 : vector<64x32xf32>
    %cst_58 = arith.constant 0.000000e+00 : bf16
    %75 = vector.broadcast %cst_58 : bf16 to vector<8x32xbf16>
    %76 = vector.extract_strided_slice %55 {offsets = [8, 0], sizes = [56, 32], strides = [1, 1]} : vector<64x32xbf16> to vector<56x32xbf16>
    %77 = tpu.concatenate %76, %75 in 0 : vector<56x32xbf16>, vector<8x32xbf16> -> vector<64x32xbf16>
    %c3_59 = arith.constant 3 : index
    %c0_60 = arith.constant 0 : index
    %c0_61 = arith.constant 0 : index
    %78 = vector.load %arg4[%c3_59, %c0_60, %c0_61] : memref<5x32x32xbf16, #tpu.memory_space<vmem>>, vector<1x32x32xbf16>
    %79 = vector.shape_cast %78 : vector<1x32x32xbf16> to vector<32x32xbf16>
    %cst_62 = arith.constant dense<0.000000e+00> : vector<64x32xf32>
    %80 = tpu.matmul %77, %79, %cst_62 {dimension_numbers = #tpu.dot_dimension_numbers<[1], [0], [0], [1], [0, 0, 1, 1], [], []>} : vector<64x32xbf16>, vector<32x32xbf16>, vector<64x32xf32> -> vector<64x32xf32>
    %81 = arith.addf %74, %80 : vector<64x32xf32>
    %cst_63 = arith.constant 0.000000e+00 : bf16
    %82 = vector.broadcast %cst_63 : bf16 to vector<16x32xbf16>
    %83 = vector.extract_strided_slice %55 {offsets = [16, 0], sizes = [48, 32], strides = [1, 1]} : vector<64x32xbf16> to vector<48x32xbf16>
    %84 = tpu.concatenate %83, %82 in 0 : vector<48x32xbf16>, vector<16x32xbf16> -> vector<64x32xbf16>
    %c4_64 = arith.constant 4 : index
    %c0_65 = arith.constant 0 : index
    %c0_66 = arith.constant 0 : index
    %85 = vector.load %arg4[%c4_64, %c0_65, %c0_66] : memref<5x32x32xbf16, #tpu.memory_space<vmem>>, vector<1x32x32xbf16>
    %86 = vector.shape_cast %85 : vector<1x32x32xbf16> to vector<32x32xbf16>
    %cst_67 = arith.constant dense<0.000000e+00> : vector<64x32xf32>
    %87 = tpu.matmul %84, %86, %cst_67 {dimension_numbers = #tpu.dot_dimension_numbers<[1], [0], [0], [1], [0, 0, 1, 1], [], []>} : vector<64x32xbf16>, vector<32x32xbf16>, vector<64x32xf32> -> vector<64x32xf32>
    %88 = arith.addf %81, %87 : vector<64x32xf32>
    %c0_68 = arith.constant 0 : index
    %c0_69 = arith.constant 0 : index
    %89 = vector.load %arg5[%c0_68, %c0_69] : memref<1x32xf32, #tpu.memory_space<vmem>>, vector<1x32xf32>
    %90 = vector.broadcast %89 : vector<1x32xf32> to vector<64x32xf32>
    %91 = arith.addf %88, %90 : vector<64x32xf32>
    %cst_70 = arith.constant 0.000000e+00 : f32
    %92 = vector.broadcast %cst_70 : f32 to vector<64x32xf32>
    %93 = arith.maximumf %91, %92 : vector<64x32xf32>
    %94 = arith.truncf %93 : vector<64x32xf32> to vector<64x32xbf16>
    %cst_71 = arith.constant 0.000000e+00 : f32
    %95 = vector.broadcast %cst_71 : f32 to vector<64x32xf32>
    %cst_72 = arith.constant 0.000000e+00 : bf16
    %96 = vector.broadcast %cst_72 : bf16 to vector<16x32xbf16>
    %97 = vector.extract_strided_slice %94 {offsets = [0, 0], sizes = [48, 32], strides = [1, 1]} : vector<64x32xbf16> to vector<48x32xbf16>
    %98 = tpu.concatenate %96, %97 in 0 : vector<16x32xbf16>, vector<48x32xbf16> -> vector<64x32xbf16>
    %c0_73 = arith.constant 0 : index
    %c0_74 = arith.constant 0 : index
    %c0_75 = arith.constant 0 : index
    %99 = vector.load %arg6[%c0_73, %c0_74, %c0_75] : memref<5x32x32xbf16, #tpu.memory_space<vmem>>, vector<1x32x32xbf16>
    %100 = vector.shape_cast %99 : vector<1x32x32xbf16> to vector<32x32xbf16>
    %cst_76 = arith.constant dense<0.000000e+00> : vector<64x32xf32>
    %101 = tpu.matmul %98, %100, %cst_76 {dimension_numbers = #tpu.dot_dimension_numbers<[1], [0], [0], [1], [0, 0, 1, 1], [], []>} : vector<64x32xbf16>, vector<32x32xbf16>, vector<64x32xf32> -> vector<64x32xf32>
    %102 = arith.addf %95, %101 : vector<64x32xf32>
    %cst_77 = arith.constant 0.000000e+00 : bf16
    %103 = vector.broadcast %cst_77 : bf16 to vector<8x32xbf16>
    %104 = vector.extract_strided_slice %94 {offsets = [0, 0], sizes = [56, 32], strides = [1, 1]} : vector<64x32xbf16> to vector<56x32xbf16>
    %105 = tpu.concatenate %103, %104 in 0 : vector<8x32xbf16>, vector<56x32xbf16> -> vector<64x32xbf16>
    %c1_78 = arith.constant 1 : index
    %c0_79 = arith.constant 0 : index
    %c0_80 = arith.constant 0 : index
    %106 = vector.load %arg6[%c1_78, %c0_79, %c0_80] : memref<5x32x32xbf16, #tpu.memory_space<vmem>>, vector<1x32x32xbf16>
    %107 = vector.shape_cast %106 : vector<1x32x32xbf16> to vector<32x32xbf16>
    %cst_81 = arith.constant dense<0.000000e+00> : vector<64x32xf32>
    %108 = tpu.matmul %105, %107, %cst_81 {dimension_numbers = #tpu.dot_dimension_numbers<[1], [0], [0], [1], [0, 0, 1, 1], [], []>} : vector<64x32xbf16>, vector<32x32xbf16>, vector<64x32xf32> -> vector<64x32xf32>
    %109 = arith.addf %102, %108 : vector<64x32xf32>
    %c2_82 = arith.constant 2 : index
    %c0_83 = arith.constant 0 : index
    %c0_84 = arith.constant 0 : index
    %110 = vector.load %arg6[%c2_82, %c0_83, %c0_84] : memref<5x32x32xbf16, #tpu.memory_space<vmem>>, vector<1x32x32xbf16>
    %111 = vector.shape_cast %110 : vector<1x32x32xbf16> to vector<32x32xbf16>
    %cst_85 = arith.constant dense<0.000000e+00> : vector<64x32xf32>
    %112 = tpu.matmul %94, %111, %cst_85 {dimension_numbers = #tpu.dot_dimension_numbers<[1], [0], [0], [1], [0, 0, 1, 1], [], []>} : vector<64x32xbf16>, vector<32x32xbf16>, vector<64x32xf32> -> vector<64x32xf32>
    %113 = arith.addf %109, %112 : vector<64x32xf32>
    %cst_86 = arith.constant 0.000000e+00 : bf16
    %114 = vector.broadcast %cst_86 : bf16 to vector<8x32xbf16>
    %115 = vector.extract_strided_slice %94 {offsets = [8, 0], sizes = [56, 32], strides = [1, 1]} : vector<64x32xbf16> to vector<56x32xbf16>
    %116 = tpu.concatenate %115, %114 in 0 : vector<56x32xbf16>, vector<8x32xbf16> -> vector<64x32xbf16>
    %c3_87 = arith.constant 3 : index
    %c0_88 = arith.constant 0 : index
    %c0_89 = arith.constant 0 : index
    %117 = vector.load %arg6[%c3_87, %c0_88, %c0_89] : memref<5x32x32xbf16, #tpu.memory_space<vmem>>, vector<1x32x32xbf16>
    %118 = vector.shape_cast %117 : vector<1x32x32xbf16> to vector<32x32xbf16>
    %cst_90 = arith.constant dense<0.000000e+00> : vector<64x32xf32>
    %119 = tpu.matmul %116, %118, %cst_90 {dimension_numbers = #tpu.dot_dimension_numbers<[1], [0], [0], [1], [0, 0, 1, 1], [], []>} : vector<64x32xbf16>, vector<32x32xbf16>, vector<64x32xf32> -> vector<64x32xf32>
    %120 = arith.addf %113, %119 : vector<64x32xf32>
    %cst_91 = arith.constant 0.000000e+00 : bf16
    %121 = vector.broadcast %cst_91 : bf16 to vector<16x32xbf16>
    %122 = vector.extract_strided_slice %94 {offsets = [16, 0], sizes = [48, 32], strides = [1, 1]} : vector<64x32xbf16> to vector<48x32xbf16>
    %123 = tpu.concatenate %122, %121 in 0 : vector<48x32xbf16>, vector<16x32xbf16> -> vector<64x32xbf16>
    %c4_92 = arith.constant 4 : index
    %c0_93 = arith.constant 0 : index
    %c0_94 = arith.constant 0 : index
    %124 = vector.load %arg6[%c4_92, %c0_93, %c0_94] : memref<5x32x32xbf16, #tpu.memory_space<vmem>>, vector<1x32x32xbf16>
    %125 = vector.shape_cast %124 : vector<1x32x32xbf16> to vector<32x32xbf16>
    %cst_95 = arith.constant dense<0.000000e+00> : vector<64x32xf32>
    %126 = tpu.matmul %123, %125, %cst_95 {dimension_numbers = #tpu.dot_dimension_numbers<[1], [0], [0], [1], [0, 0, 1, 1], [], []>} : vector<64x32xbf16>, vector<32x32xbf16>, vector<64x32xf32> -> vector<64x32xf32>
    %127 = arith.addf %120, %126 : vector<64x32xf32>
    %c0_96 = arith.constant 0 : index
    %c0_97 = arith.constant 0 : index
    %128 = vector.load %arg7[%c0_96, %c0_97] : memref<1x32xf32, #tpu.memory_space<vmem>>, vector<1x32xf32>
    %129 = vector.broadcast %128 : vector<1x32xf32> to vector<64x32xf32>
    %130 = arith.addf %127, %129 : vector<64x32xf32>
    %cst_98 = arith.constant 0.000000e+00 : f32
    %131 = vector.broadcast %cst_98 : f32 to vector<64x32xf32>
    %132 = arith.maximumf %130, %131 : vector<64x32xf32>
    %133 = arith.truncf %132 : vector<64x32xf32> to vector<64x32xbf16>
    %cst_99 = arith.constant 0.000000e+00 : f32
    %134 = vector.broadcast %cst_99 : f32 to vector<8x128xf32>
    %135 = vector.extract_strided_slice %133 {offsets = [0, 0], sizes = [8, 32], strides = [1, 1]} : vector<64x32xbf16> to vector<8x32xbf16>
    %c0_100 = arith.constant 0 : index
    %c0_101 = arith.constant 0 : index
    %136 = vector.load %arg8[%c0_100, %c0_101] : memref<256x128xbf16, #tpu.memory_space<vmem>>, vector<32x128xbf16>
    %cst_102 = arith.constant dense<0.000000e+00> : vector<8x128xf32>
    %137 = tpu.matmul %135, %136, %cst_102 {dimension_numbers = #tpu.dot_dimension_numbers<[1], [0], [0], [1], [0, 0, 1, 1], [], []>} : vector<8x32xbf16>, vector<32x128xbf16>, vector<8x128xf32> -> vector<8x128xf32>
    %138 = arith.addf %134, %137 : vector<8x128xf32>
    %139 = vector.extract_strided_slice %133 {offsets = [8, 0], sizes = [8, 32], strides = [1, 1]} : vector<64x32xbf16> to vector<8x32xbf16>
    %c32 = arith.constant 32 : index
    %c0_103 = arith.constant 0 : index
    %140 = vector.load %arg8[%c32, %c0_103] : memref<256x128xbf16, #tpu.memory_space<vmem>>, vector<32x128xbf16>
    %cst_104 = arith.constant dense<0.000000e+00> : vector<8x128xf32>
    %141 = tpu.matmul %139, %140, %cst_104 {dimension_numbers = #tpu.dot_dimension_numbers<[1], [0], [0], [1], [0, 0, 1, 1], [], []>} : vector<8x32xbf16>, vector<32x128xbf16>, vector<8x128xf32> -> vector<8x128xf32>
    %142 = arith.addf %138, %141 : vector<8x128xf32>
    %143 = vector.extract_strided_slice %133 {offsets = [16, 0], sizes = [8, 32], strides = [1, 1]} : vector<64x32xbf16> to vector<8x32xbf16>
    %c64 = arith.constant 64 : index
    %c0_105 = arith.constant 0 : index
    %144 = vector.load %arg8[%c64, %c0_105] : memref<256x128xbf16, #tpu.memory_space<vmem>>, vector<32x128xbf16>
    %cst_106 = arith.constant dense<0.000000e+00> : vector<8x128xf32>
    %145 = tpu.matmul %143, %144, %cst_106 {dimension_numbers = #tpu.dot_dimension_numbers<[1], [0], [0], [1], [0, 0, 1, 1], [], []>} : vector<8x32xbf16>, vector<32x128xbf16>, vector<8x128xf32> -> vector<8x128xf32>
    %146 = arith.addf %142, %145 : vector<8x128xf32>
    %147 = vector.extract_strided_slice %133 {offsets = [24, 0], sizes = [8, 32], strides = [1, 1]} : vector<64x32xbf16> to vector<8x32xbf16>
    %c96 = arith.constant 96 : index
    %c0_107 = arith.constant 0 : index
    %148 = vector.load %arg8[%c96, %c0_107] : memref<256x128xbf16, #tpu.memory_space<vmem>>, vector<32x128xbf16>
    %cst_108 = arith.constant dense<0.000000e+00> : vector<8x128xf32>
    %149 = tpu.matmul %147, %148, %cst_108 {dimension_numbers = #tpu.dot_dimension_numbers<[1], [0], [0], [1], [0, 0, 1, 1], [], []>} : vector<8x32xbf16>, vector<32x128xbf16>, vector<8x128xf32> -> vector<8x128xf32>
    %150 = arith.addf %146, %149 : vector<8x128xf32>
    %151 = vector.extract_strided_slice %133 {offsets = [32, 0], sizes = [8, 32], strides = [1, 1]} : vector<64x32xbf16> to vector<8x32xbf16>
    %c128 = arith.constant 128 : index
    %c0_109 = arith.constant 0 : index
    %152 = vector.load %arg8[%c128, %c0_109] : memref<256x128xbf16, #tpu.memory_space<vmem>>, vector<32x128xbf16>
    %cst_110 = arith.constant dense<0.000000e+00> : vector<8x128xf32>
    %153 = tpu.matmul %151, %152, %cst_110 {dimension_numbers = #tpu.dot_dimension_numbers<[1], [0], [0], [1], [0, 0, 1, 1], [], []>} : vector<8x32xbf16>, vector<32x128xbf16>, vector<8x128xf32> -> vector<8x128xf32>
    %154 = arith.addf %150, %153 : vector<8x128xf32>
    %155 = vector.extract_strided_slice %133 {offsets = [40, 0], sizes = [8, 32], strides = [1, 1]} : vector<64x32xbf16> to vector<8x32xbf16>
    %c160 = arith.constant 160 : index
    %c0_111 = arith.constant 0 : index
    %156 = vector.load %arg8[%c160, %c0_111] : memref<256x128xbf16, #tpu.memory_space<vmem>>, vector<32x128xbf16>
    %cst_112 = arith.constant dense<0.000000e+00> : vector<8x128xf32>
    %157 = tpu.matmul %155, %156, %cst_112 {dimension_numbers = #tpu.dot_dimension_numbers<[1], [0], [0], [1], [0, 0, 1, 1], [], []>} : vector<8x32xbf16>, vector<32x128xbf16>, vector<8x128xf32> -> vector<8x128xf32>
    %158 = arith.addf %154, %157 : vector<8x128xf32>
    %159 = vector.extract_strided_slice %133 {offsets = [48, 0], sizes = [8, 32], strides = [1, 1]} : vector<64x32xbf16> to vector<8x32xbf16>
    %c192 = arith.constant 192 : index
    %c0_113 = arith.constant 0 : index
    %160 = vector.load %arg8[%c192, %c0_113] : memref<256x128xbf16, #tpu.memory_space<vmem>>, vector<32x128xbf16>
    %cst_114 = arith.constant dense<0.000000e+00> : vector<8x128xf32>
    %161 = tpu.matmul %159, %160, %cst_114 {dimension_numbers = #tpu.dot_dimension_numbers<[1], [0], [0], [1], [0, 0, 1, 1], [], []>} : vector<8x32xbf16>, vector<32x128xbf16>, vector<8x128xf32> -> vector<8x128xf32>
    %162 = arith.addf %158, %161 : vector<8x128xf32>
    %163 = vector.extract_strided_slice %133 {offsets = [56, 0], sizes = [8, 32], strides = [1, 1]} : vector<64x32xbf16> to vector<8x32xbf16>
    %c224 = arith.constant 224 : index
    %c0_115 = arith.constant 0 : index
    %164 = vector.load %arg8[%c224, %c0_115] : memref<256x128xbf16, #tpu.memory_space<vmem>>, vector<32x128xbf16>
    %cst_116 = arith.constant dense<0.000000e+00> : vector<8x128xf32>
    %165 = tpu.matmul %163, %164, %cst_116 {dimension_numbers = #tpu.dot_dimension_numbers<[1], [0], [0], [1], [0, 0, 1, 1], [], []>} : vector<8x32xbf16>, vector<32x128xbf16>, vector<8x128xf32> -> vector<8x128xf32>
    %166 = arith.addf %162, %165 : vector<8x128xf32>
    %c0_117 = arith.constant 0 : index
    %c0_118 = arith.constant 0 : index
    %167 = vector.load %arg9[%c0_117, %c0_118] : memref<1x128xf32, #tpu.memory_space<vmem>>, vector<1x128xf32>
    %168 = vector.broadcast %167 : vector<1x128xf32> to vector<8x128xf32>
    %169 = arith.addf %166, %168 : vector<8x128xf32>
    %cst_119 = arith.constant 0.000000e+00 : f32
    %170 = vector.broadcast %cst_119 : f32 to vector<8x128xf32>
    %171 = arith.maximumf %169, %170 : vector<8x128xf32>
    %172 = arith.truncf %171 : vector<8x128xf32> to vector<8x128xbf16>
    %c0_120 = arith.constant 0 : index
    %c0_121 = arith.constant 0 : index
    %173 = vector.load %arg10[%c0_120, %c0_121] : memref<128x128xbf16, #tpu.memory_space<vmem>>, vector<128x128xbf16>
    %cst_122 = arith.constant dense<0.000000e+00> : vector<8x128xf32>
    %174 = tpu.matmul %172, %173, %cst_122 {dimension_numbers = #tpu.dot_dimension_numbers<[1], [0], [0], [1], [0, 0, 1, 1], [], []>} : vector<8x128xbf16>, vector<128x128xbf16>, vector<8x128xf32> -> vector<8x128xf32>
    %c0_123 = arith.constant 0 : index
    %c0_124 = arith.constant 0 : index
    %175 = vector.load %arg11[%c0_123, %c0_124] : memref<1x128xf32, #tpu.memory_space<vmem>>, vector<1x128xf32>
    %176 = vector.broadcast %175 : vector<1x128xf32> to vector<8x128xf32>
    %177 = arith.addf %174, %176 : vector<8x128xf32>
    %cst_125 = arith.constant dense<0xFF800000> : vector<8xf32>
    %178 = vector.multi_reduction <maximumf>, %177, %cst_125 [1] : vector<8x128xf32> to vector<8xf32>
    %179 = vector.shape_cast %178 : vector<8xf32> to vector<8x1xf32>
    %180 = vector.broadcast %179 : vector<8x1xf32> to vector<8x128xf32>
    %181 = arith.subf %177, %180 : vector<8x128xf32>
    %182 = math.exp %181 : vector<8x128xf32>
    %cst_126 = arith.constant dense<0.000000e+00> : vector<8xf32>
    %183 = vector.multi_reduction <add>, %182, %cst_126 [1] : vector<8x128xf32> to vector<8xf32>
    %184 = vector.shape_cast %183 : vector<8xf32> to vector<8x1xf32>
    %185 = math.log %184 : vector<8x1xf32>
    %186 = arith.addf %179, %185 : vector<8x1xf32>
    %187 = vector.broadcast %186 : vector<8x1xf32> to vector<8x128xf32>
    %188 = arith.subf %177, %187 : vector<8x128xf32>
    %c0_127 = arith.constant 0 : index
    %c0_128 = arith.constant 0 : index
    %189 = vector.load %arg12[%c0_127, %c0_128] : memref<8x128xf32, #tpu.memory_space<vmem>>, vector<8x128xf32>
    tpu.vector_store %arg12[%c0_127, %c0_128], %188 {strides = array<i32>} : memref<8x128xf32, #tpu.memory_space<vmem>>, vector<8x128xf32>,
    return
  }
  func.func @transform_0(%arg0: i32) -> (i32, i32, i32) {
    %c0_i32 = arith.constant 0 : i32
    %c0_i32_0 = arith.constant 0 : i32
    %c0_i32_1 = arith.constant 0 : i32
    return %c0_i32, %arg0, %c0_i32_0 : i32, i32, i32
  }
  func.func @transform_1(%arg0: i32) -> (i32, i32, i32) {
    %c0_i32 = arith.constant 0 : i32
    %c0_i32_0 = arith.constant 0 : i32
    %c0_i32_1 = arith.constant 0 : i32
    %c0_i32_2 = arith.constant 0 : i32
    return %c0_i32, %c0_i32_0, %c0_i32_1 : i32, i32, i32
  }
  func.func @transform_2(%arg0: i32) -> (i32, i32) {
    %c0_i32 = arith.constant 0 : i32
    %c0_i32_0 = arith.constant 0 : i32
    %c0_i32_1 = arith.constant 0 : i32
    return %c0_i32, %c0_i32_0 : i32, i32
  }
  func.func @transform_3(%arg0: i32) -> (i32, i32, i32) {
    %c0_i32 = arith.constant 0 : i32
    %c0_i32_0 = arith.constant 0 : i32
    %c0_i32_1 = arith.constant 0 : i32
    %c0_i32_2 = arith.constant 0 : i32
    return %c0_i32, %c0_i32_0, %c0_i32_1 : i32, i32, i32
  }
  func.func @transform_4(%arg0: i32) -> (i32, i32) {
    %c0_i32 = arith.constant 0 : i32
    %c0_i32_0 = arith.constant 0 : i32
    %c0_i32_1 = arith.constant 0 : i32
    return %c0_i32, %c0_i32_0 : i32, i32
  }
  func.func @transform_5(%arg0: i32) -> (i32, i32, i32) {
    %c0_i32 = arith.constant 0 : i32
    %c0_i32_0 = arith.constant 0 : i32
    %c0_i32_1 = arith.constant 0 : i32
    %c0_i32_2 = arith.constant 0 : i32
    return %c0_i32, %c0_i32_0, %c0_i32_1 : i32, i32, i32
  }
  func.func @transform_6(%arg0: i32) -> (i32, i32) {
    %c0_i32 = arith.constant 0 : i32
    %c0_i32_0 = arith.constant 0 : i32
    %c0_i32_1 = arith.constant 0 : i32
    return %c0_i32, %c0_i32_0 : i32, i32
  }
  func.func @transform_7(%arg0: i32) -> (i32, i32) {
    %c0_i32 = arith.constant 0 : i32
    %c0_i32_0 = arith.constant 0 : i32
    %c0_i32_1 = arith.constant 0 : i32
    return %c0_i32, %c0_i32_0 : i32, i32
  }
  func.func @transform_8(%arg0: i32) -> (i32, i32) {
    %c0_i32 = arith.constant 0 : i32
    %c0_i32_0 = arith.constant 0 : i32
    %c0_i32_1 = arith.constant 0 : i32
    return %c0_i32, %c0_i32_0 : i32, i32
  }
  func.func @transform_9(%arg0: i32) -> (i32, i32) {
    %c0_i32 = arith.constant 0 : i32
    %c0_i32_0 = arith.constant 0 : i32
    %c0_i32_1 = arith.constant 0 : i32
    return %c0_i32, %c0_i32_0 : i32, i32
  }
  func.func @transform_10(%arg0: i32) -> (i32, i32) {
    %c0_i32 = arith.constant 0 : i32
    %c0_i32_0 = arith.constant 0 : i32
    %c0_i32_1 = arith.constant 0 : i32
    return %c0_i32, %c0_i32_0 : i32, i32
  }
  func.func @transform_11(%arg0: i32) -> (i32, i32) {
    %c0_i32 = arith.constant 0 : i32
    %c0_i32_0 = arith.constant 0 : i32
    return %arg0, %c0_i32 : i32, i32
  }
}

</mosaic_0001>

<bundles_post_ra>
// kernel: tpu_custom_call.1
= control target key start
LH: loop header
LB: loop body
LE: loop exit
PB: predicated region body
PF: predicated region fallthrough
CT: control target
= control target key end

     0   :  { %16 = vsyncpa [#allocation3], 0  ;;  %s2191_s0 = inlined_call_operand.vmem [shape: bf16[8,8,4], index: 0, kind: input, shape index: {}]   ;;  %s2192_s1 = inlined_call_operand.vmem [shape: bf16[5,4,32], index: 1, kind: input, shape index: {}]   ;;  %s2193_s2 = inlined_call_operand.vmem [shape: f32[1,32], index: 2, kind: input, shape index: {}]   ;;  %s2194_s3 = inlined_call_operand.hbm [shape: bf16[5,32,32], index: 3, kind: input, shape index: {}]   ;;  %s2195_s4 = inlined_call_operand.vmem [shape: f32[1,32], index: 4, kind: input, shape index: {}]   ;;  %s2196_s5 = inlined_call_operand.hbm [shape: bf16[5,32,32], index: 5, kind: input, shape index: {}]   ;;  %s2197_s6 = inlined_call_operand.vmem [shape: f32[1,32], index: 6, kind: input, shape index: {}]   ;;  %s2198_s7 = inlined_call_operand.hbm [shape: bf16[256,128], index: 7, kind: input, shape index: {}]   ;;  %s2199_s8 = inlined_call_operand.vmem [shape: f32[1,128], index: 8, kind: input, shape index: {}]   ;;  %s2200_s9 = inlined_call_operand.hbm [shape: bf16[128,128], index: 9, kind: input, shape index: {}]   ;;  %s2201_s10 = inlined_call_operand.vmem [shape: f32[1,128], index: 10, kind: input, shape index: {}]   ;;  %s2202_s11 = inlined_call_operand.hbm [shape: f32[8,128], index: 11, kind: output, shape index: {}]  }
   0x1   :  { %17 = vsyncpa [#allocation6], 0 }
   0x2   :  { %18 = vsyncpa [#allocation9], 0 }
   0x3   :  { %19 = vsyncpa [#allocation4], 0  ;;  %s45_s19 = sshll.u32 %s2196_s5, 4  ;;  %s1899_s20 = smov [#allocation5]   ;;  %s46_s19 = int_to_ptr.hbm [resolvable:$true] %s45_s19 }
   0x4   :  { %s47_s21 = sshll.u32 %s1899_s20, 4  ;;  %s30_s24 = sshll.u32 %s2194_s3, 4  ;;  %s48_s21 = int_to_ptr.vmem [resolvable:$true] %s47_s21  ;;  %s31_s24 = int_to_ptr.hbm [resolvable:$true] %s30_s24 }
   0x5   :  { %s1900_s25 = smov 64   ;;  %s1901_s26 = smov 4  }
   0x6   :  { %53 = dma.hbm_to_vmem [thread:$0]  %s46_s19, 1280, %s48_s21, [#allocation6], %s1900_s25, %s1900_s25, %s1901_s26  }
   0x7   :  { %s1902_s27 = smov [#allocation2]   ;;  %s60_s12 = sshll.u32 %s2198_s7, 4  ;;  %s61_s12 = int_to_ptr.hbm [resolvable:$true] %s60_s12 }
   0x8   :  { %s32_s28 = sshll.u32 %s1902_s27, 4  ;;  %s75_s14 = sshll.u32 %s2200_s9, 4  ;;  %s33_s28 = int_to_ptr.vmem [resolvable:$true] %s32_s28  ;;  %s76_s14 = int_to_ptr.hbm [resolvable:$true] %s75_s14 }
   0x9   :  { %38 = dma.hbm_to_vmem [thread:$0]  %s31_s24, 1280, %s33_s28, [#allocation3], %s1900_s25, %s1900_s25, %s1901_s26  }
   0xa   :  { %s1903_s15 = smov [#allocation7]   ;;  %s1904_s3 = smov [#allocation8]  }
   0xb   :  { %s62_s16 = sshll.u32 %s1903_s15, 4  ;;  %s77_s17 = sshll.u32 %s1904_s3, 4  ;;  %s63_s16 = int_to_ptr.vmem [resolvable:$true] %s62_s16  ;;  %s78_s17 = int_to_ptr.vmem [resolvable:$true] %s77_s17 }
   0xc   :  { %68 = dma.hbm_to_vmem [thread:$0]  %s61_s12, 2048, %s63_s16, [#allocation6], %s1900_s25, %s1900_s25, %s1901_s26  }
   0xd   :  { %83 = dma.hbm_to_vmem [thread:$0]  %s76_s14, 1024, %s78_s17, [#allocation9], %s1900_s25, %s1900_s25, %s1901_s26  }
   0xe   :  { %1891 = dma.done.wait [#allocation3], 1280  }
   0xf   :  { %1892 = vsyncadd [#allocation3], 4294966016 }
  0x10   :  { %1893 = dma.done.wait [#allocation6], 3328  }
  0x11   :  { %1894 = vsyncadd [#allocation6], 4294963968 }
  0x12   :  { %1895 = dma.done.wait [#allocation9], 1024  }
  0x13   :  { %1896 = vsyncadd [#allocation9], 4294966272  ;;  %vm173_vm0 = vcmask 1041408   ;;  %v1467_v0 = vld [vmem:[%s2192_s1 + $0x2] sm:$0x3]  ;;  %vm130_vm1 = vcmask 1043456  }
  0x14   :  { %v1460_v1 = vld [vmem:[%s2191_s0 + $0x4] sm:$0xf]  ;;  %v175_v2 = vsel %vm173_vm0, %v1467_v0, 0  ;;  %v103_v3 = vld [vmem:[%s2191_s0] sm:$0xf]  ;;  %vm161_vm2 = vcmask 31744  }
  0x15   :  { %v119_v4 = vunpack.c.l.b16 %v1460_v1  ;;  %v1464_v5 = vld [vmem:[%s2191_s0 + $0x14] sm:$0xf]  ;;  %184 = vmatpush.bf16.msra.mxu0 %v175_v2  ;;  %1753 = vmatpush.bf16.msra.mxu1 %v175_v2  ;;  %v1463_v6 = vld [vmem:[%s2191_s0 + $0x10] sm:$0xf]  ;;  %v1466_v7 = vld [vmem:[%s2191_s0 + $0x1c] sm:$0xf] }
  0x16   :  { %v125_v8 = vunpack.c.l.b16 %v1464_v5  ;;  %v1485_v9 = vld [vmem:[%s2192_s1 + $0x8] sm:$0x3]  ;;  %v128_v11 = vunpack.c.l.b16 %v1466_v7  ;;  %v1475_v13 = vld [vmem:[%s2192_s1 + $0x4] sm:$0x3]  ;;  %v1480_v14 = vld [vmem:[%s2192_s1 + $0x6] sm:$0x3] }
  0x17   :  { %v120_v10 = vpack.c.b16 %v119_v4, %v119_v4  ;;  %v339_v12 = vsel %vm173_vm0, %v1485_v9, 0  ;;  %v1465_v15 = vld [vmem:[%s2191_s0 + $0x18] sm:$0xf]  ;;  %v251_v17 = vsel %vm173_vm0, %v1475_v13, 0  ;;  %v297_v18 = vsel %vm173_vm0, %v1480_v14, 0  ;;  %v1711_v41 = vld [vmem:[#allocation2 + $0x10] sm:$0xff] }
  0x18   :  { %v126_v16 = vpack.c.b16 %v125_v8, %v125_v8  ;;  %v143_v19 = vld [vmem:[%s2192_s1] sm:$0x3]  ;;  %v129_v21 = vpack.c.b16 %v128_v11, %v128_v11  ;;  %260 = vmatpush.bf16.msra.mxu2 %v251_v17  ;;  %306 = vmatpush.bf16.msra.mxu3 %v297_v18  ;;  %v1461_v23 = vld [vmem:[%s2191_s0 + $0x8] sm:$0xf]  ;;  %v1462_v24 = vld [vmem:[%s2191_s0 + $0xc] sm:$0xf] }
  0x19   :  { %348 = vmatpush.bf16.msrb.mxu0 %v339_v12  ;;  %v133_v20 = vsel %vm130_vm1, %v103_v3, %v120_v10  ;;  %v215_v22 = vsel %vm173_vm0, %v143_v19, 0  ;;  %v122_v27 = vunpack.c.l.b16 %v1462_v24  ;;  %v1905_v37 = vmov 0   ;;  %v1712_v40 = vld [vmem:[#allocation2 + $0x18] sm:$0xff]  ;;  %v1710_v46 = vld [vmem:[#allocation2 + $0x8] sm:$0xff]  ;;  %v1709_v48 = vld [vmem:[#allocation2] sm:$0xff] }
  0x1a   :  { %v149_v25 = vrot.slane %v133_v20, 4  ;;  %v139_v26 = vsel %vm130_vm1, %v1463_v6, %v126_v16  ;;  %224 = vmatpush.bf16.msrb.mxu1 %v215_v22  ;;  %v142_v28 = vsel %vm130_vm1, %v1465_v15, %v129_v21  ;;  %v1714_v52 = vld [vmem:[#allocation2 + $0x28] sm:$0xff]  ;;  %v1716_v56 = vld [vmem:[#allocation2 + $0x38] sm:$0xff]  ;;  %v1713_v58 = vld [vmem:[#allocation2 + $0x20] sm:$0xff]  ;;  %vm450_vm3 = vcmask 261120  }
  0x1b   :  { %v152_v29 = vrot.slane %v139_v26, 4  ;;  %v154_v31 = vrot.slane %v142_v28, 4  ;;  %1476 = vmatmul.msk.bf16.vlgmr.msra.gmra.mxu2 %vm161_vm2, %v133_v20  ;;  %v123_v32 = vpack.c.b16 %v122_v27, %v122_v27  ;;  %v1718_v57 = vld [vmem:[#allocation2 + $0x48] sm:$0xff]  ;;  %v1715_v0 = vld [vmem:[#allocation2 + $0x30] sm:$0xff]  ;;  %v2062_v5 = vld [vmem:[%s2193_s2] ss:$0 sm:$0xff] }
  0x1c   :  { %v158_v30 = vsel %vm130_vm1, 0, %v149_v25  ;;  %520 = vmatpush.bf16.msrb.mxu2 %v1710_v46  ;;  %572 = vmatpush.bf16.msrb.mxu3 %v1714_v52 }
  0x1d   :  { %1468 = vmatmul.msk.bf16.vlgmr.msra.gmra.mxu0 %vm161_vm2, %v158_v30  ;;  %v155_v33 = vsel %vm130_vm1, %v152_v29, %v154_v31  ;;  %v136_v34 = vsel %vm130_vm1, %v1461_v23, %v123_v32  ;;  %v291_v39 = vsel %vm130_vm1, %v154_v31, 0 }
  0x1e   :  { %1471 = vmatmul.msk.bf16.vlgmr.msra.gmra.mxu1 %vm161_vm2, %v155_v33  ;;  %v150_v35 = vrot.slane %v136_v34, 4  ;;  %631 = vmatpush.bf16.msra.mxu0 %v1716_v56 }
  0x1f   :  { %468 = vmatpush.bf16.msra.mxu1 %v1712_v40 }
  0x20   :  { %v151_v36 = vsel %vm130_vm1, %v149_v25, %v150_v35  ;;  %v153_v38 = vsel %vm130_vm1, %v150_v35, %v152_v29  ;;  %521 = vmatpush.bf16.msrb.mxu2 %v1709_v48  ;;  %573 = vmatpush.bf16.msrb.mxu3 %v1713_v58 }
  0x21   :  { %1481 = vmatmul.msk.bf16.vlgmr.msra.gmra.mxu3 %vm161_vm2, %v151_v36 }
  0x22   :  { %632 = vmatpush.bf16.msra.mxu0 %v1715_v0 }
  0x23   :  { %469 = vmatpush.bf16.msra.mxu1 %v1711_v41 }
  0x2b   :  { %1477 = vmatmul.msk.bf16.gmra.mxu2 %vm161_vm2, %v136_v34 }
  0x2d   :  { %1469 = vmatmul.msk.bf16.gmra.mxu0 %vm161_vm2, %v151_v36 }
  0x2e   :  { %225 = vmatmul.bf16.vlgmr.msrb.gmra.mxu1 %v1905_v37 }
  0x2f   :  { %685 = vmatpush.bf16.msrb.mxu1 %v1718_v57 }
  0x31   :  { %1482 = vmatmul.msk.bf16.gmra.mxu3 %vm161_vm2, %v153_v38 }
  0x3b   :  { %1478 = vmatmul.msk.bf16.gmra.mxu2 %vm161_vm2, %v139_v26 }
  0x3d   :  { %1470 = vmatmul.msk.bf16.gmra.mxu0 %vm161_vm2, %v153_v38 }
  0x3e   :  { %1472 = vmatmul.msk.bf16.gmra.mxu1 %vm161_vm2, %v133_v20 }
  0x41   :  { %1483 = vmatmul.msk.bf16.gmra.mxu3 %vm161_vm2, %v155_v33  ;;  %v1717_v33 = vld [vmem:[#allocation2 + $0x40] sm:$0xff] }
  0x42   :  { %686 = vmatpush.bf16.msrb.mxu1 %v1717_v33 }
  0x4b   :  { %1479 = vmatmul.msk.bf16.gmra.mxu2 %vm161_vm2, %v142_v28 }
  0x4d   :  { %1486 = vmatmul.msk.bf16.vlgmr.msrb.gmra.mxu0 %vm161_vm2, %v136_v34 }
  0x4e   :  { %1473 = vmatmul.msk.bf16.gmra.mxu1 %vm161_vm2, %v136_v34 }
  0x51   :  { %1484 = vmatmul.msk.bf16.gmra.mxu3 %vm161_vm2, %v291_v39 }
  0x5b   :  { %522 = vmatmul.bf16.vlgmr.msrb.gmra.mxu2 %v1905_v37 }
  0x5d   :  { %1487 = vmatmul.msk.bf16.gmra.mxu0 %vm161_vm2, %v139_v26 }
  0x5e   :  { %1474 = vmatmul.msk.bf16.gmra.mxu1 %vm161_vm2, %v139_v26 }
  0x6d   :  { %1488 = vmatmul.msk.bf16.gmra.mxu0 %vm161_vm2, %v142_v28 }
  0x7d   :  { %364 = vmatmul.bf16.gmra.mxu0 %v1905_v37 }
  0x9a   :  { %v186_v42 = vpop.f32.mrf.mxu0 }
  0x9b   :  { %v2052_v43 = vpop.f32.mrf.mxu1 }
  0x9e   :  { %v262_v51 = vpop.f32.mrf.mxu2 }
  0xa2   :  { %v188_v44 = vpop.f32.mrf.mxu0 }
  0xa3   :  { %v2054_v45 = vpop.f32.mrf.mxu1 }
  0xa4   :  { %v308_v53 = vpop.f32.mrf.mxu3 }
  0xa6   :  { %v264_v59 = vpop.f32.mrf.mxu2 }
  0xaa   :  { %v191_v47 = vpop.f32.mrf.mxu0 }
  0xab   :  { %v226_v49 = vpop.f32.mrf.mxu1 }
  0xac   :  { %v227_v60 = vadd.f32 %v226_v49, %v186_v42  ;;  %v310_v61 = vpop.f32.mrf.mxu3 }
  0xae   :  { %v282_v1 = vadd.f32 %v262_v51, %v227_v60  ;;  %v267_v2 = vpop.f32.mrf.mxu2 }
  0xb0   :  { %v328_v3 = vadd.f32 %v308_v53, %v282_v1 }
  0xb2   :  { %v193_v50 = vpop.f32.mrf.mxu0 }
  0xb3   :  { %v228_v54 = vpop.f32.mrf.mxu1 }
  0xb4   :  { %v229_v4 = vadd.f32 %v228_v54, %v188_v44  ;;  %v313_v8 = vpop.f32.mrf.mxu3 }
  0xb6   :  { %v283_v9 = vadd.f32 %v264_v59, %v229_v4  ;;  %v269_v16 = vpop.f32.mrf.mxu2 }
  0xb8   :  { %v329_v13 = vadd.f32 %v310_v61, %v283_v9 }
  0xba   :  { %v196_v55 = vpop.f32.mrf.mxu0 }
  0xbb   :  { %v231_v63 = vpop.f32.mrf.mxu1 }
  0xbc   :  { %v232_v14 = vadd.f32 %v231_v63, %v191_v47  ;;  %v315_v23 = vpop.f32.mrf.mxu3 }
  0xbe   :  { %v284_v20 = vadd.f32 %v267_v2, %v232_v14  ;;  %v272_v34 = vpop.f32.mrf.mxu2 }
  0xc0   :  { %v330_v27 = vadd.f32 %v313_v8, %v284_v20 }
  0xc2   :  { %v2057_v62 = vpop.f32.mrf.mxu0 }
  0xc3   :  { %v233_v11 = vpop.f32.mrf.mxu1 }
  0xc4   :  { %v234_v28 = vadd.f32 %v233_v11, %v193_v50  ;;  %v318_v40 = vpop.f32.mrf.mxu3 }
  0xc6   :  { %v285_v35 = vadd.f32 %v269_v16, %v234_v28  ;;  %v274_v53 = vpop.f32.mrf.mxu2 }
  0xc8   :  { %v331_v41 = vadd.f32 %v315_v23, %v285_v35 }
  0xca   :  { %v350_v6 = vpop.f32.mrf.mxu0 }
  0xcb   :  { %v370_v7 = vadd.f32 %v350_v6, %v328_v3  ;;  %v236_v26 = vpop.f32.mrf.mxu1 }
  0xcc   :  { %v237_v42 = vadd.f32 %v236_v26, %v196_v55  ;;  %v320_v55 = vpop.f32.mrf.mxu3 }
  0xcd   :  { %v382_v10 = vadd.f32 %v2062_v5, %v370_v7 }
  0xce   :  { %v286_v50 = vadd.f32 %v272_v34, %v237_v42  ;;  %v277_v4 = vpop.f32.mrf.mxu2 }
  0xcf   :  { %v390_v12 = vmax.f32 %v382_v10, 0.0 }
  0xd0   :  { %v332_v56 = vadd.f32 %v318_v40, %v286_v50  ;;  %v1719_v50 = vld [vmem:[#allocation5] sm:$0xff] }
  0xd1   :  { %v398_v15 = vpack.c.bf16 %v390_v12, %v390_v12 }
  0xd2   :  { %v352_v17 = vpop.f32.mrf.mxu0 }
  0xd3   :  { %v412_v18 = vunpack.c.l.b16 %v398_v15  ;;  %v371_v19 = vadd.f32 %v352_v17, %v329_v13  ;;  %v238_v46 = vpop.f32.mrf.mxu1 }
  0xd4   :  { %v239_v57 = vadd.f32 %v238_v46, %v2057_v62  ;;  %v323_v11 = vpop.f32.mrf.mxu3 }
  0xd5   :  { %v427_v21 = vpack.c.b16 %v412_v18, %v412_v18  ;;  %v383_v22 = vadd.f32 %v2062_v5, %v371_v19 }
  0xd6   :  { %v287_v0 = vadd.f32 %v274_v53, %v239_v57 }
  0xd7   :  { %v391_v24 = vmax.f32 %v383_v22, 0.0  ;;  %v432_v25 = vsel %vm130_vm1, 0, %v427_v21 }
  0xd8   :  { %1497 = vmatmul.msk.bf16.vlgmr.msra.gmra.mxu1 %vm450_vm3, %v432_v25  ;;  %v333_v6 = vadd.f32 %v320_v55, %v287_v0  ;;  %v1723_v55 = vld [vmem:[#allocation5 + $0x20] sm:$0xff] }
  0xd9   :  { %v399_v29 = vpack.c.bf16 %v391_v24, %v391_v24 }
  0xda   :  { %v355_v30 = vpop.f32.mrf.mxu0 }
  0xdb   :  { %v413_v31 = vunpack.c.l.b16 %v399_v29  ;;  %v372_v32 = vadd.f32 %v355_v30, %v330_v27  ;;  %v241_v63 = vpop.f32.mrf.mxu1 }
  0xdc   :  { %v242_v7 = vadd.f32 %v241_v63, %v2052_v43  ;;  %v279_v43 = vpop.f32.mrf.mxu2  ;;  %v325_v26 = vpop.f32.mrf.mxu3 }
  0xdd   :  { %v384_v36 = vadd.f32 %v2062_v5, %v372_v32  ;;  %v418_v38 = vpack.c.b16 %v413_v31, %v412_v18 }
  0xde   :  { %v288_v12 = vadd.f32 %v277_v4, %v242_v7 }
  0xdf   :  { %v392_v39 = vmax.f32 %v384_v36, 0.0  ;;  %1509 = vmatmul.msk.bf16.gmra.mxu2 %vm450_vm3, %v418_v38  ;;  %1520 = vmatmul.msk.bf16.vlgmr.msrb.gmra.mxu3 %vm450_vm3, %v418_v38 }
  0xe0   :  { %v334_v17 = vadd.f32 %v323_v11, %v288_v12 }
  0xe1   :  { %v400_v44 = vpack.c.bf16 %v392_v39, %v392_v39 }
  0xe2   :  { %v357_v47 = vpop.f32.mrf.mxu0 }
  0xe3   :  { %v414_v48 = vunpack.c.l.b16 %v400_v44  ;;  %v373_v49 = vadd.f32 %v357_v47, %v331_v41  ;;  %v243_v15 = vpop.f32.mrf.mxu1  ;;  %v1721_v44 = vld [vmem:[#allocation5 + $0x10] sm:$0xff] }
  0xe4   :  { %v244_v18 = vadd.f32 %v243_v15, %v2054_v45 }
  0xe5   :  { %v428_v51 = vpack.c.b16 %v414_v48, %v413_v31  ;;  %v385_v52 = vadd.f32 %v2062_v5, %v373_v49 }
  0xe6   :  { %v289_v23 = vadd.f32 %v279_v43, %v244_v18 }
  0xe7   :  { %v393_v54 = vmax.f32 %v385_v52, 0.0  ;;  %1532 = vmatmul.msk.bf16.vlgmr.msra.gmra.mxu0 %vm450_vm3, %v428_v51  ;;  %v523_v52 = vpop.f32.mrf.mxu2 }
  0xe8   :  { %1498 = vmatmul.msk.bf16.gmra.mxu1 %vm450_vm3, %v428_v51  ;;  %v335_v28 = vadd.f32 %v325_v26, %v289_v23 }
  0xe9   :  { %v401_v58 = vpack.c.bf16 %v393_v54, %v393_v54 }
  0xea   :  { %v360_v59 = vpop.f32.mrf.mxu0 }
  0xeb   :  { %v415_v60 = vunpack.c.l.b16 %v401_v58  ;;  %v374_v61 = vadd.f32 %v360_v59, %v332_v56  ;;  %v1724_v56 = vld [vmem:[#allocation5 + $0x28] sm:$0xff] }
  0xec   :  { %907 = vmatpush.bf16.msrb.mxu0 %v1724_v56  ;;  %v1728_v58 = vld [vmem:[#allocation5 + $0x48] sm:$0xff] }
  0xed   :  { %v386_v1 = vadd.f32 %v2062_v5, %v374_v61  ;;  %v419_v2 = vpack.c.b16 %v415_v60, %v414_v48  ;;  %v1720_v48 = vld [vmem:[#allocation5 + $0x8] sm:$0xff]  ;;  %v1726_v61 = vld [vmem:[#allocation5 + $0x38] sm:$0xff] }
  0xee   :  { %855 = vmatpush.bf16.msra.mxu3 %v1720_v48  ;;  %966 = vmatpush.bf16.msra.mxu1 %v1726_v61 }
  0xef   :  { %v394_v3 = vmax.f32 %v386_v1, 0.0  ;;  %1510 = vmatmul.msk.bf16.gmra.mxu2 %vm450_vm3, %v419_v2  ;;  %1521 = vmatmul.msk.bf16.gmra.mxu3 %vm450_vm3, %v419_v2  ;;  %v525_v59 = vpop.f32.mrf.mxu2 }
  0xf0   :  { %908 = vmatpush.bf16.msrb.mxu0 %v1723_v55 }
  0xf1   :  { %v402_v62 = vpack.c.bf16 %v394_v3, %v394_v3 }
  0xf2   :  { %v362_v8 = vpop.f32.mrf.mxu0  ;;  %856 = vmatpush.bf16.msra.mxu3 %v1719_v50 }
  0xf3   :  { %v416_v9 = vunpack.c.l.b16 %v402_v62  ;;  %v375_v10 = vadd.f32 %v362_v8, %v333_v6  ;;  %v2108_v62 = vld [vmem:[%s2195_s4] ss:$0 sm:$0xff] }
  0xf5   :  { %v387_v13 = vadd.f32 %v2062_v5, %v375_v10  ;;  %v429_v14 = vpack.c.b16 %v416_v9, %v415_v60 }
  0xf7   :  { %v395_v16 = vmax.f32 %v387_v13, 0.0  ;;  %1533 = vmatmul.msk.bf16.gmra.mxu0 %vm450_vm3, %v429_v14 }
  0xf8   :  { %1499 = vmatmul.msk.bf16.gmra.mxu1 %vm450_vm3, %v429_v14 }
  0xf9   :  { %v403_v19 = vpack.c.bf16 %v395_v16, %v395_v16 }
  0xfa   :  { %v365_v20 = vpop.f32.mrf.mxu0 }
  0xfb   :  { %v417_v21 = vunpack.c.l.b16 %v403_v19  ;;  %v376_v22 = vadd.f32 %v365_v20, %v334_v17 }
  0xfd   :  { %v388_v24 = vadd.f32 %v2062_v5, %v376_v22  ;;  %v420_v25 = vpack.c.b16 %v417_v21, %v416_v9 }
  0xff   :  { %v396_v27 = vmax.f32 %v388_v24, 0.0  ;;  %1511 = vmatmul.msk.bf16.gmra.mxu2 %vm450_vm3, %v420_v25  ;;  %1522 = vmatmul.msk.bf16.gmra.mxu3 %vm450_vm3, %v420_v25 }
 0x101   :  { %v404_v29 = vpack.c.bf16 %v396_v27, %v396_v27 }
 0x102   :  { %v367_v30 = vpop.f32.mrf.mxu0 }
 0x103   :  { %v426_v31 = vunpack.c.l.b16 %v404_v29  ;;  %v377_v45 = vadd.f32 %v367_v30, %v335_v28 }
 0x105   :  { %v389_v32 = vadd.f32 %v2062_v5, %v377_v45  ;;  %v430_v33 = vpack.c.b16 %v426_v31, %v417_v21  ;;  %v1722_v5 = vld [vmem:[#allocation5 + $0x18] sm:$0xff] }
 0x106   :  { %805 = vmatpush.bf16.msra.mxu2 %v1722_v5 }
 0x107   :  { %v397_v34 = vmax.f32 %v389_v32, 0.0  ;;  %1534 = vmatmul.msk.bf16.gmra.mxu0 %vm450_vm3, %v430_v33 }
 0x108   :  { %1500 = vmatmul.msk.bf16.gmra.mxu1 %vm450_vm3, %v430_v33 }
 0x109   :  { %v405_v35 = vpack.c.bf16 %v397_v34, %v397_v34  ;;  %v1727_v34 = vld [vmem:[#allocation5 + $0x40] sm:$0xff] }
 0x10a   :  { %806 = vmatpush.bf16.msra.mxu2 %v1721_v44 }
 0x10b   :  { %v549_v36 = vunpack.c.l.b16 %v405_v35 }
 0x10d   :  { %v550_v38 = vpack.c.b16 %v549_v36, %v426_v31  ;;  %v603_v39 = vpack.c.b16 %v549_v36, %v549_v36 }
 0x10e   :  { %1020 = vmatpush.bf16.msrb.mxu2 %v1728_v58 }
 0x10f   :  { %1523 = vmatmul.msk.bf16.gmra.mxu3 %vm450_vm3, %v550_v38  ;;  %v605_v40 = vsel %vm130_vm1, %v603_v39, 0 }
 0x112   :  { %1021 = vmatpush.bf16.msrb.mxu2 %v1727_v34 }
 0x117   :  { %1535 = vmatmul.msk.bf16.gmra.mxu0 %vm450_vm3, %v605_v40 }
 0x118   :  { %1544 = vmatmul.msk.bf16.vlgmr.msrb.gmra.mxu1 %vm450_vm3, %v419_v2  ;;  %v1725_v2 = vld [vmem:[#allocation5 + $0x30] sm:$0xff] }
 0x119   :  { %967 = vmatpush.bf16.msra.mxu1 %v1725_v2 }
 0x11f   :  { %857 = vmatmul.bf16.vlgmr.msra.gmra.mxu3 %v1905_v37 }
 0x128   :  { %1545 = vmatmul.msk.bf16.gmra.mxu1 %vm450_vm3, %v420_v25 }
 0x138   :  { %1546 = vmatmul.msk.bf16.gmra.mxu1 %vm450_vm3, %v550_v38 }
 0x148   :  { %702 = vmatmul.bf16.gmra.mxu1 %v1905_v37 }
 0x155   :  { %v471_v41 = vpop.f32.mrf.mxu1 }
 0x156   :  { %v524_v1 = vadd.f32 %v523_v52, %v471_v41 }
 0x15d   :  { %v473_v42 = vpop.f32.mrf.mxu1 }
 0x15e   :  { %v526_v9 = vadd.f32 %v525_v59, %v473_v42 }
 0x162   :  { %v575_v53 = vpop.f32.mrf.mxu3  ;;  %v528_v4 = vpop.f32.mrf.mxu2 }
 0x163   :  { %v595_v3 = vadd.f32 %v575_v53, %v524_v1 }
 0x164   :  { %v634_v54 = vpop.f32.mrf.mxu0 }
 0x165   :  { %v476_v46 = vpop.f32.mrf.mxu1  ;;  %v654_v7 = vadd.f32 %v634_v54, %v595_v3 }
 0x166   :  { %v529_v43 = vadd.f32 %v528_v4, %v476_v46 }
 0x16a   :  { %v577_v60 = vpop.f32.mrf.mxu3  ;;  %v530_v15 = vpop.f32.mrf.mxu2 }
 0x16b   :  { %v596_v12 = vadd.f32 %v577_v60, %v526_v9 }
 0x16c   :  { %v636_v63 = vpop.f32.mrf.mxu0 }
 0x16d   :  { %v478_v47 = vpop.f32.mrf.mxu1  ;;  %v655_v16 = vadd.f32 %v636_v63, %v596_v12 }
 0x16e   :  { %v531_v31 = vadd.f32 %v530_v15, %v478_v47 }
 0x172   :  { %v580_v6 = vpop.f32.mrf.mxu3  ;;  %v533_v45 = vpop.f32.mrf.mxu2 }
 0x173   :  { %v597_v22 = vadd.f32 %v580_v6, %v529_v43 }
 0x174   :  { %v639_v11 = vpop.f32.mrf.mxu0 }
 0x175   :  { %v2096_v49 = vpop.f32.mrf.mxu1  ;;  %v656_v28 = vadd.f32 %v639_v11, %v597_v22 }
 0x176   :  { %v534_v46 = vadd.f32 %v533_v45, %v2096_v49 }
 0x17a   :  { %v582_v18 = vpop.f32.mrf.mxu3  ;;  %v535_v50 = vpop.f32.mrf.mxu2 }
 0x17b   :  { %v598_v36 = vadd.f32 %v582_v18, %v531_v31 }
 0x17c   :  { %v641_v25 = vpop.f32.mrf.mxu0 }
 0x17d   :  { %v2099_v51 = vpop.f32.mrf.mxu1  ;;  %v657_v41 = vadd.f32 %v641_v25, %v598_v36 }
 0x17e   :  { %v536_v63 = vadd.f32 %v535_v50, %v2099_v51 }
 0x182   :  { %v585_v35 = vpop.f32.mrf.mxu3  ;;  %v538_v6 = vpop.f32.mrf.mxu2 }
 0x183   :  { %v599_v52 = vadd.f32 %v585_v35, %v534_v46  ;;  %v1731_v46 = vld [vmem:[#allocation7 + $0x10] sm:$0xff] }
 0x184   :  { %v644_v5 = vpop.f32.mrf.mxu0 }
 0x185   :  { %v2101_v57 = vpop.f32.mrf.mxu1  ;;  %v658_v55 = vadd.f32 %v644_v5, %v599_v52 }
 0x186   :  { %v539_v12 = vadd.f32 %v538_v6, %v2101_v57 }
 0x18a   :  { %v587_v56 = vpop.f32.mrf.mxu3 }
 0x18b   :  { %v600_v2 = vadd.f32 %v587_v56, %v536_v63  ;;  %v1742_v56 = vld [vmem:[#allocation7 + $0x68] sm:$0xff] }
 0x18c   :  { %v646_v60 = vpop.f32.mrf.mxu0 }
 0x18d   :  { %v2103_v0 = vpop.f32.mrf.mxu1  ;;  %v659_v9 = vadd.f32 %v646_v60, %v600_v2  ;;  %v1738_v60 = vld [vmem:[#allocation7 + $0x48] sm:$0xff]  ;;  %v1729_v2 = vld [vmem:[#allocation7] sm:$0xff] }
 0x18e   :  { %1234 = vmatpush.bf16.msra.mxu0 %v1738_v60 }
 0x195   :  { %v688_v8 = vpop.f32.mrf.mxu1 }
 0x196   :  { %v708_v10 = vadd.f32 %v688_v8, %v654_v7  ;;  %v590_v8 = vpop.f32.mrf.mxu3 }
 0x197   :  { %v601_v15 = vadd.f32 %v590_v8, %v539_v12 }
 0x198   :  { %v720_v13 = vadd.f32 %v2108_v62, %v708_v10 }
 0x19a   :  { %v728_v14 = vmax.f32 %v720_v13, 0.0 }
 0x19c   :  { %v736_v17 = vpack.c.bf16 %v728_v14, %v728_v14  ;;  %v649_v14 = vpop.f32.mrf.mxu0 }
 0x19d   :  { %v690_v19 = vpop.f32.mrf.mxu1  ;;  %v660_v43 = vadd.f32 %v649_v14, %v601_v15 }
 0x19e   :  { %v750_v20 = vunpack.c.l.b16 %v736_v17  ;;  %v709_v21 = vadd.f32 %v690_v19, %v655_v16  ;;  %v540_v19 = vpop.f32.mrf.mxu2 }
 0x1a0   :  { %v765_v23 = vpack.c.b16 %v750_v20, %v750_v20  ;;  %v721_v24 = vadd.f32 %v2108_v62, %v709_v21  ;;  %v592_v21 = vpop.f32.mrf.mxu3 }
 0x1a2   :  { %v729_v26 = vmax.f32 %v721_v24, 0.0  ;;  %v770_v27 = vsel %vm130_vm1, 0, %v765_v23  ;;  %v541_v23 = vadd.f32 %v540_v19, %v2103_v0  ;;  %v1734_v19 = vld [vmem:[#allocation7 + $0x28] sm:$0xff] }
 0x1a3   :  { %1555 = vmatmul.msk.bf16.vlgmr.msra.gmra.mxu2 %vm450_vm3, %v770_v27 }
 0x1a4   :  { %v737_v29 = vpack.c.bf16 %v729_v26, %v729_v26  ;;  %v602_v25 = vadd.f32 %v592_v21, %v541_v23  ;;  %1300 = vmatpush.bf16.msra.mxu2 %v1742_v56 }
 0x1a5   :  { %v693_v30 = vpop.f32.mrf.mxu1 }
 0x1a6   :  { %v751_v32 = vunpack.c.l.b16 %v737_v29  ;;  %v710_v33 = vadd.f32 %v693_v30, %v656_v28  ;;  %v651_v28 = vpop.f32.mrf.mxu0 }
 0x1a7   :  { %v661_v30 = vadd.f32 %v651_v28, %v602_v25  ;;  %v1733_v25 = vld [vmem:[#allocation7 + $0x20] sm:$0xff] }
 0x1a8   :  { %v722_v38 = vadd.f32 %v2108_v62, %v710_v33  ;;  %v756_v39 = vpack.c.b16 %v751_v32, %v750_v20  ;;  %v858_v52 = vpop.f32.mrf.mxu3 }
 0x1aa   :  { %v730_v40 = vmax.f32 %v722_v38, 0.0  ;;  %1567 = vmatmul.msk.bf16.gmra.mxu3 %vm450_vm3, %v756_v39  ;;  %1578 = vmatmul.msk.bf16.vlgmr.msrb.gmra.mxu0 %vm450_vm3, %v756_v39 }
 0x1ac   :  { %v738_v42 = vpack.c.bf16 %v730_v40, %v730_v40 }
 0x1ad   :  { %v695_v44 = vpop.f32.mrf.mxu1 }
 0x1ae   :  { %v752_v47 = vunpack.c.l.b16 %v738_v42  ;;  %v711_v48 = vadd.f32 %v695_v44, %v657_v41 }
 0x1b0   :  { %v766_v53 = vpack.c.b16 %v752_v47, %v751_v32  ;;  %v723_v54 = vadd.f32 %v2108_v62, %v711_v48 }
 0x1b2   :  { %v731_v58 = vmax.f32 %v723_v54, 0.0  ;;  %1590 = vmatmul.msk.bf16.vlgmr.msra.gmra.mxu1 %vm450_vm3, %v766_v53 }
 0x1b3   :  { %1556 = vmatmul.msk.bf16.gmra.mxu2 %vm450_vm3, %v766_v53 }
 0x1b4   :  { %v739_v59 = vpack.c.bf16 %v731_v58, %v731_v58 }
 0x1b5   :  { %v698_v61 = vpop.f32.mrf.mxu1 }
 0x1b6   :  { %v753_v49 = vunpack.c.l.b16 %v739_v59  ;;  %v712_v1 = vadd.f32 %v698_v61, %v658_v55  ;;  %v1730_v59 = vld [vmem:[#allocation7 + $0x8] sm:$0xff]  ;;  %v1740_v61 = vld [vmem:[#allocation7 + $0x58] sm:$0xff] }
 0x1b7   :  { %1267 = vmatpush.bf16.msrb.mxu1 %v1740_v61 }
 0x1b8   :  { %v724_v3 = vadd.f32 %v2108_v62, %v712_v1  ;;  %v757_v4 = vpack.c.b16 %v753_v49, %v752_v47 }
 0x1ba   :  { %v732_v7 = vmax.f32 %v724_v3, 0.0  ;;  %1568 = vmatmul.msk.bf16.gmra.mxu3 %vm450_vm3, %v757_v4  ;;  %1579 = vmatmul.msk.bf16.gmra.mxu0 %vm450_vm3, %v757_v4 }
 0x1bc   :  { %v740_v10 = vpack.c.bf16 %v732_v7, %v732_v7 }
 0x1bd   :  { %v700_v11 = vpop.f32.mrf.mxu1 }
 0x1be   :  { %v754_v13 = vunpack.c.l.b16 %v740_v10  ;;  %v713_v51 = vadd.f32 %v700_v11, %v659_v9  ;;  %v1737_v9 = vld [vmem:[#allocation7 + $0x40] sm:$0xff] }
 0x1bf   :  { %1235 = vmatpush.bf16.msra.mxu0 %v1737_v9 }
 0x1c0   :  { %v767_v16 = vpack.c.b16 %v754_v13, %v753_v49  ;;  %v725_v17 = vadd.f32 %v2108_v62, %v713_v51 }
 0x1c2   :  { %v733_v18 = vmax.f32 %v725_v17, 0.0  ;;  %1591 = vmatmul.msk.bf16.gmra.mxu1 %vm450_vm3, %v767_v16 }
 0x1c3   :  { %1557 = vmatmul.msk.bf16.gmra.mxu2 %vm450_vm3, %v767_v16 }
 0x1c4   :  { %v741_v20 = vpack.c.bf16 %v733_v18, %v733_v18 }
 0x1c5   :  { %v703_v22 = vpop.f32.mrf.mxu1 }
 0x1c6   :  { %v755_v57 = vunpack.c.l.b16 %v741_v20  ;;  %v714_v24 = vadd.f32 %v703_v22, %v660_v43  ;;  %v1739_v43 = vld [vmem:[#allocation7 + $0x50] sm:$0xff]  ;;  %v1741_v22 = vld [vmem:[#allocation7 + $0x60] sm:$0xff] }
 0x1c7   :  { %1268 = vmatpush.bf16.msrb.mxu1 %v1739_v43  ;;  %1301 = vmatpush.bf16.msra.mxu2 %v1741_v22 }
 0x1c8   :  { %v726_v26 = vadd.f32 %v2108_v62, %v714_v24  ;;  %v758_v27 = vpack.c.b16 %v755_v57, %v754_v13  ;;  %v2154_v13 = vld [vmem:[%s2197_s6] ss:$0 sm:$0xff] }
 0x1ca   :  { %v734_v29 = vmax.f32 %v726_v26, 0.0  ;;  %1569 = vmatmul.msk.bf16.gmra.mxu3 %vm450_vm3, %v758_v27  ;;  %1580 = vmatmul.msk.bf16.gmra.mxu0 %vm450_vm3, %v758_v27 }
 0x1cc   :  { %v742_v31 = vpack.c.bf16 %v734_v29, %v734_v29 }
 0x1cd   :  { %v705_v45 = vpop.f32.mrf.mxu1 }
 0x1ce   :  { %v764_v32 = vunpack.c.l.b16 %v742_v31  ;;  %v715_v33 = vadd.f32 %v705_v45, %v661_v30 }
 0x1d0   :  { %v768_v34 = vpack.c.b16 %v764_v32, %v755_v57  ;;  %v727_v0 = vadd.f32 %v2108_v62, %v715_v33  ;;  %v1732_v62 = vld [vmem:[#allocation7 + $0x18] sm:$0xff] }
 0x1d1   :  { %1108 = vmatpush.bf16.msrb.mxu3 %v1732_v62 }
 0x1d2   :  { %v735_v35 = vmax.f32 %v727_v0, 0.0  ;;  %1592 = vmatmul.msk.bf16.gmra.mxu1 %vm450_vm3, %v768_v34 }
 0x1d3   :  { %1558 = vmatmul.msk.bf16.gmra.mxu2 %vm450_vm3, %v768_v34 }
 0x1d4   :  { %v743_v36 = vpack.c.bf16 %v735_v35, %v735_v35  ;;  %v1736_v35 = vld [vmem:[#allocation7 + $0x38] sm:$0xff] }
 0x1d5   :  { %1109 = vmatpush.bf16.msrb.mxu3 %v1731_v46  ;;  %v1735_v46 = vld [vmem:[#allocation7 + $0x30] sm:$0xff] }
 0x1d6   :  { %v884_v38 = vunpack.c.l.b16 %v743_v36 }
 0x1d8   :  { %v885_v39 = vpack.c.b16 %v884_v38, %v764_v32  ;;  %v938_v40 = vpack.c.b16 %v884_v38, %v884_v38 }
 0x1d9   :  { %1136 = vmatpush.bf16.msra.mxu3 %v1730_v59 }
 0x1da   :  { %1581 = vmatmul.msk.bf16.gmra.mxu0 %vm450_vm3, %v885_v39  ;;  %v940_v5 = vsel %vm130_vm1, %v938_v40, 0 }
 0x1dd   :  { %1137 = vmatpush.bf16.msra.mxu3 %v1729_v2 }
 0x1e2   :  { %1593 = vmatmul.msk.bf16.gmra.mxu1 %vm450_vm3, %v940_v5 }
 0x1e3   :  { %1602 = vmatmul.msk.bf16.vlgmr.msrb.gmra.mxu2 %vm450_vm3, %v757_v4 }
 0x1f3   :  { %1603 = vmatmul.msk.bf16.gmra.mxu2 %vm450_vm3, %v758_v27 }
 0x203   :  { %1604 = vmatmul.msk.bf16.gmra.mxu2 %vm450_vm3, %v885_v39 }
 0x213   :  { %1037 = vmatmul.bf16.gmra.mxu2 %v1905_v37  ;;  %v860_v37 = vpop.f32.mrf.mxu3 }
 0x226   :  { %v808_v41 = vpop.f32.mrf.mxu2 }
 0x227   :  { %v910_v53 = vpop.f32.mrf.mxu0  ;;  %v859_v15 = vadd.f32 %v858_v52, %v808_v41 }
 0x229   :  { %v930_v20 = vadd.f32 %v910_v53, %v859_v15 }
 0x22d   :  { %v863_v1 = vpop.f32.mrf.mxu3 }
 0x22e   :  { %v810_v42 = vpop.f32.mrf.mxu2 }
 0x22f   :  { %v969_v54 = vpop.f32.mrf.mxu1  ;;  %v912_v55 = vpop.f32.mrf.mxu0  ;;  %v861_v6 = vadd.f32 %v860_v37, %v810_v42 }
 0x230   :  { %v989_v57 = vadd.f32 %v969_v54, %v930_v20 }
 0x231   :  { %v931_v8 = vadd.f32 %v912_v55, %v861_v6 }
 0x235   :  { %v865_v11 = vpop.f32.mrf.mxu3 }
 0x236   :  { %v813_v44 = vpop.f32.mrf.mxu2 }
 0x237   :  { %v971_v63 = vpop.f32.mrf.mxu1  ;;  %v915_v3 = vpop.f32.mrf.mxu0  ;;  %v864_v45 = vadd.f32 %v863_v1, %v813_v44 }
 0x238   :  { %v990_v10 = vadd.f32 %v971_v63, %v931_v8 }
 0x239   :  { %v932_v36 = vadd.f32 %v915_v3, %v864_v45  ;;  %v1751_v45 = vld [vmem:[#allocation8 + $0x30] sm:$0xff] }
 0x23d   :  { %v868_v24 = vpop.f32.mrf.mxu3 }
 0x23e   :  { %v2143_v47 = vpop.f32.mrf.mxu2 }
 0x23f   :  { %v974_v7 = vpop.f32.mrf.mxu1  ;;  %v2156_v14 = vpop.f32.mrf.mxu0  ;;  %v866_v1 = vadd.f32 %v865_v11, %v2143_v47  ;;  %v1743_v11 = vld [vmem:[#allocation7 + $0x70] sm:$0xff] }
 0x240   :  { %v991_v62 = vadd.f32 %v974_v7, %v932_v36  ;;  %v1744_v7 = vld [vmem:[#allocation7 + $0x78] sm:$0xff] }
 0x241   :  { %v933_v8 = vadd.f32 %v2156_v14, %v866_v1 }
 0x245   :  { %v870_v33 = vpop.f32.mrf.mxu3 }
 0x246   :  { %v818_v48 = vpop.f32.mrf.mxu2 }
 0x247   :  { %v2159_v17 = vpop.f32.mrf.mxu1  ;;  %v920_v27 = vpop.f32.mrf.mxu0  ;;  %v869_v31 = vadd.f32 %v868_v24, %v818_v48 }
 0x249   :  { %v934_v34 = vadd.f32 %v920_v27, %v869_v31  ;;  %v1752_v31 = vld [vmem:[#allocation8 + $0x38] sm:$0xff] }
 0x24a   :  { %1416 = vmatpush.bf16.msrb.mxu0 %v1752_v31 }
 0x24d   :  { %v873_v54 = vpop.f32.mrf.mxu3 }
 0x24e   :  { %v2145_v50 = vpop.f32.mrf.mxu2  ;;  %1417 = vmatpush.bf16.msrb.mxu0 %v1751_v45 }
 0x24f   :  { %v979_v28 = vpop.f32.mrf.mxu1  ;;  %v922_v0 = vpop.f32.mrf.mxu0  ;;  %v871_v41 = vadd.f32 %v870_v33, %v2145_v50 }
 0x250   :  { %v993_v38 = vadd.f32 %v979_v28, %v934_v34  ;;  %v1750_v34 = vld [vmem:[#allocation8 + $0x28] sm:$0xff] }
 0x251   :  { %v935_v52 = vadd.f32 %v922_v0, %v871_v41  ;;  %v1749_v0 = vld [vmem:[#allocation8 + $0x20] sm:$0xff] }
 0x252   :  { %1418 = vmatpush.bf16.msrb.mxu0 %v1750_v34  ;;  %v1745_v41 = vld [vmem:[#allocation8] sm:$0xff] }
 0x256   :  { %v2147_v58 = vpop.f32.mrf.mxu2  ;;  %1419 = vmatpush.bf16.msrb.mxu0 %v1749_v0 }
 0x257   :  { %v981_v40 = vpop.f32.mrf.mxu1  ;;  %v925_v59 = vpop.f32.mrf.mxu0  ;;  %v874_v50 = vadd.f32 %v873_v54, %v2147_v58  ;;  %v992_v58 = vadd.f32 %v2159_v17, %v933_v8 }
 0x258   :  { %v994_v56 = vadd.f32 %v981_v40, %v935_v52 }
 0x25e   :  { %v2149_v49 = vpop.f32.mrf.mxu2 }
 0x25f   :  { %v984_v63 = vpop.f32.mrf.mxu1  ;;  %v927_v47 = vpop.f32.mrf.mxu0 }
 0x266   :  { %v1023_v4 = vpop.f32.mrf.mxu2 }
 0x267   :  { %v1043_v26 = vadd.f32 %v1023_v4, %v989_v57  ;;  %v936_v4 = vadd.f32 %v925_v59, %v874_v50  ;;  %v986_v43 = vpop.f32.mrf.mxu1 }
 0x269   :  { %v1055_v29 = vadd.f32 %v2154_v13, %v1043_v26  ;;  %v995_v9 = vadd.f32 %v984_v63, %v936_v4  ;;  %v1766_v4 = vld [vmem:[%s2201_s10] ss:$0 sm:$0xff]  ;;  %s1448_s10 = sshll.u32 %s2202_s11, 4  ;;  %s1449_s10 = int_to_ptr.hbm [resolvable:$true] %s1448_s10 }
 0x26b   :  { %v1063_v32 = vmax.f32 %v1055_v29, 0.0 }
 0x26d   :  { %v1071_v39 = vpack.c.bf16 %v1063_v32, %v1063_v32 }
 0x26e   :  { %v1025_v12 = vpop.f32.mrf.mxu2 }
 0x26f   :  { %v1044_v51 = vadd.f32 %v1025_v12, %v990_v10 }
 0x271   :  { %v1056_v16 = vadd.f32 %v2154_v13, %v1044_v51  ;;  %v875_v51 = vpop.f32.mrf.mxu3 }
 0x273   :  { %v1064_v18 = vmax.f32 %v1056_v16, 0.0  ;;  %v876_v16 = vadd.f32 %v875_v51, %v2149_v49 }
 0x275   :  { %v1072_v21 = vpack.c.bf16 %v1064_v18, %v1064_v18  ;;  %v937_v20 = vadd.f32 %v927_v47, %v876_v16 }
 0x276   :  { %v1028_v23 = vpop.f32.mrf.mxu2 }
 0x277   :  { %1613 = vmatmul.msk.bf16.vlgmr.msrb.gmra.mxu3 %vm450_vm3, %v1072_v21  ;;  %v1045_v48 = vadd.f32 %v1028_v23, %v991_v62  ;;  %v996_v22 = vadd.f32 %v986_v43, %v937_v20  ;;  %v1746_v62 = vld [vmem:[#allocation8 + $0x8] sm:$0xff] }
 0x278   :  { %1168 = vmatpush.bf16.msrb.mxu3 %v1734_v19 }
 0x279   :  { %v1057_v37 = vadd.f32 %v2154_v13, %v1045_v48 }
 0x27b   :  { %v1065_v2 = vmax.f32 %v1057_v37, 0.0 }
 0x27c   :  { %1169 = vmatpush.bf16.msrb.mxu3 %v1733_v25 }
 0x27d   :  { %v1073_v10 = vpack.c.bf16 %v1065_v2, %v1065_v2 }
 0x27e   :  { %v1030_v30 = vpop.f32.mrf.mxu2 }
 0x27f   :  { %v1046_v19 = vadd.f32 %v1030_v30, %v992_v58 }
 0x281   :  { %v1058_v17 = vadd.f32 %v2154_v13, %v1046_v19 }
 0x283   :  { %v1066_v24 = vmax.f32 %v1058_v17, 0.0 }
 0x285   :  { %v1074_v26 = vpack.c.bf16 %v1066_v24, %v1066_v24 }
 0x286   :  { %v1033_v5 = vpop.f32.mrf.mxu2 }
 0x287   :  { %v1047_v42 = vadd.f32 %v1033_v5, %v993_v38  ;;  %1622 = vmatmul.msk.bf16.vlgmr.msra.gmra.mxu3 %vm450_vm3, %v1071_v39  ;;  %v1747_v39 = vld [vmem:[#allocation8 + $0x10] sm:$0xff] }
 0x288   :  { %1201 = vmatpush.bf16.msra.mxu3 %v1736_v35 }
 0x289   :  { %v1059_v44 = vadd.f32 %v2154_v13, %v1047_v42 }
 0x28b   :  { %v1067_v53 = vmax.f32 %v1059_v44, 0.0 }
 0x28c   :  { %1202 = vmatpush.bf16.msra.mxu3 %v1735_v46 }
 0x28d   :  { %v1075_v55 = vpack.c.bf16 %v1067_v53, %v1067_v53 }
 0x28e   :  { %v1035_v60 = vpop.f32.mrf.mxu2 }
 0x28f   :  { %v1048_v61 = vadd.f32 %v1035_v60, %v994_v56  ;;  %1649 = vmatmul.msk.bf16.vlgmr.msra.gmra.mxu0 %vm450_vm3, %v1075_v55  ;;  %v1765_v60 = vld [vmem:[%s2199_s8] ss:$0 sm:$0xff]  ;;  %s1906_s8 = smov [#allocation10]  }
 0x290   :  { %s1446_s24 = sshll.u32 %s1906_s8, 4  ;;  %s1447_s24 = int_to_ptr.vmem [resolvable:$true] %s1446_s24 }
 0x291   :  { %v1060_v3 = vadd.f32 %v2154_v13, %v1048_v61 }
 0x293   :  { %v1068_v6 = vmax.f32 %v1060_v3, 0.0 }
 0x295   :  { %v1076_v12 = vpack.c.bf16 %v1068_v6, %v1068_v6 }
 0x296   :  { %v1038_v15 = vpop.f32.mrf.mxu2 }
 0x297   :  { %v1049_v18 = vadd.f32 %v1038_v15, %v995_v9  ;;  %1631 = vmatmul.msk.bf16.vlgmr.msrb.gmra.mxu3 %vm450_vm3, %v1073_v10  ;;  %1658 = vmatmul.msk.bf16.vlgmr.msrb.gmra.mxu1 %vm450_vm3, %v1076_v12 }
 0x298   :  { %1333 = vmatpush.bf16.msrb.mxu3 %v1744_v7 }
 0x299   :  { %v1061_v14 = vadd.f32 %v2154_v13, %v1049_v18 }
 0x29b   :  { %v1069_v21 = vmax.f32 %v1061_v14, 0.0 }
 0x29c   :  { %1334 = vmatpush.bf16.msrb.mxu3 %v1743_v11 }
 0x29d   :  { %v1077_v23 = vpack.c.bf16 %v1069_v21, %v1069_v21 }
 0x29e   :  { %v1040_v49 = vpop.f32.mrf.mxu2 }
 0x29f   :  { %v1050_v57 = vadd.f32 %v1040_v49, %v996_v22  ;;  %1667 = vmatmul.msk.bf16.vlgmr.msra.gmra.mxu2 %vm450_vm3, %v1077_v23 }
 0x2a1   :  { %v1062_v25 = vadd.f32 %v2154_v13, %v1050_v57  ;;  %v1748_v13 = vld [vmem:[#allocation8 + $0x18] sm:$0xff] }
 0x2a2   :  { %1420 = vmatpush.bf16.msrb.mxu0 %v1748_v13 }
 0x2a3   :  { %v1070_v27 = vmax.f32 %v1062_v25, 0.0 }
 0x2a5   :  { %v1078_v28 = vpack.c.bf16 %v1070_v27, %v1070_v27 }
 0x2a6   :  { %1421 = vmatpush.bf16.msrb.mxu0 %v1747_v39 }
 0x2a7   :  { %1640 = vmatmul.msk.bf16.vlgmr.msra.gmra.mxu3 %vm450_vm3, %v1074_v26 }
 0x2aa   :  { %1422 = vmatpush.bf16.msrb.mxu0 %v1746_v62 }
 0x2ae   :  { %1423 = vmatpush.bf16.msrb.mxu0 %v1745_v41 }
 0x2b7   :  { %1676 = vmatmul.msk.bf16.vlgmr.msrb.gmra.mxu3 %vm450_vm3, %v1078_v28 }
 0x2fa   :  { %v1111_v29 = vpop.f32.mrf.mxu3 }
 0x302   :  { %v1113_v30 = vpop.f32.mrf.mxu3 }
 0x30a   :  { %v1139_v32 = vpop.f32.mrf.mxu3 }
 0x30b   :  { %v1140_v48 = vadd.f32 %v1139_v32, %v1111_v29 }
 0x30c   :  { %v1237_v33 = vpop.f32.mrf.mxu0 }
 0x312   :  { %v1141_v35 = vpop.f32.mrf.mxu3 }
 0x314   :  { %v1239_v36 = vpop.f32.mrf.mxu0  ;;  %v1270_v38 = vpop.f32.mrf.mxu1 }
 0x31a   :  { %v1171_v40 = vpop.f32.mrf.mxu3 }
 0x31b   :  { %v1175_v53 = vadd.f32 %v1171_v40, %v1140_v48 }
 0x31c   :  { %v1272_v5 = vpop.f32.mrf.mxu1 }
 0x322   :  { %v1173_v42 = vpop.f32.mrf.mxu3  ;;  %v1303_v46 = vpop.f32.mrf.mxu2 }
 0x32a   :  { %v1204_v44 = vpop.f32.mrf.mxu3  ;;  %v1305_v52 = vpop.f32.mrf.mxu2 }
 0x32b   :  { %v1208_v54 = vadd.f32 %v1204_v44, %v1175_v53 }
 0x32d   :  { %v1241_v56 = vadd.f32 %v1237_v33, %v1208_v54 }
 0x32f   :  { %v1274_v55 = vadd.f32 %v1270_v38, %v1241_v56 }
 0x331   :  { %v1307_v59 = vadd.f32 %v1303_v46, %v1274_v55 }
 0x332   :  { %v1206_v37 = vpop.f32.mrf.mxu3 }
 0x33a   :  { %v1336_v50 = vpop.f32.mrf.mxu3 }
 0x33b   :  { %v1340_v61 = vadd.f32 %v1336_v50, %v1307_v59 }
 0x33d   :  { %v1345_v63 = vadd.f32 %v1765_v60, %v1340_v61 }
 0x33f   :  { %v1346_v1 = vmax.f32 %v1345_v63, 0.0 }
 0x341   :  { %v1347_v2 = vpack.c.bf16 %v1346_v1, %v1346_v1 }
 0x342   :  { %v1338_v3 = vpop.f32.mrf.mxu3 }
 0x343   :  { %1424 = vmatmul.bf16.vlgmr.msrb.gmra.mxu0 %v1347_v2 }
 0x3c0   :  { %v1425_v6 = vpop.f32.mrf.mxu0 }
 0x3c1   :  { %v1426_v7 = vadd.f32 %v1766_v4, %v1425_v6 }
 0x3c3   :  { %1429 = vmax.xlane.f32.xlu0 %v1426_v7 }
 0x3c8   :  { %v1427_v8 = vpop.f32.mrf.mxu0 }
 0x436   :  { %v1430_v9 = vpop.xlane.xlu0 %1429 }
 0x437   :  { %v1431_v10 = vsub.f32 %v1426_v7, %v1430_v9 }
 0x439   :  { %v1432_v12 = vmul.f32 1.442695, %v1431_v10 }
 0x43b   :  { %1767 = vpow2.f32 %v1432_v12 }
 0x441   :  { %v1768_v51 = vpop.eup %1767 }
 0x442   :  { %1434 = vadd.xlane.f32.xlu0 %v1768_v51 }
 0x4b5   :  { %v1435_v15 = vpop.xlane.xlu0 %1434 }
 0x4b6   :  { %1769 = vlog2.f32 %v1435_v15 }
 0x4bc   :  { %v1770_v58 = vpop.eup %1769 }
 0x4bd   :  { %v1437_v16 = vmul.f32 0.6931472, %v1770_v58 }
 0x4bf   :  { %v1438_v18 = vadd.f32 %v1437_v16, %v1430_v9 }
 0x4c1   :  { %v1439_v47 = vsub.f32 %v1426_v7, %v1438_v18 }
 0x4c3   :  { %1440 = vst [vmem:[#allocation10] sm:$0xff] %v1439_v47 }
 0x4c4   :  { %1451 = dma.vmem_to_hbm [thread:$0]  %s1447_s24, 128, %s1449_s10, [#allocation4]  }
 0x4c5   :  { %1897 = dma.done.wait [#allocation4], 128  }
 0x4c6   :  { %1898 = vsyncadd [#allocation4], 4294967168 }
 0x4c7   :  { %1456 = vsyncpa [#allocation3], 1 }
 0x4c8   :  { %1457 = vsyncpa [#allocation6], 1 }
 0x4c9   :  { %1458 = vsyncpa [#allocation9], 1 }
 0x4ca   :  { %1459 = vsyncpa [#allocation4], 1 }

</bundles_post_ra>
